<compile_context>
chip_gen: v6e
topology: v6e:2x2x1
jax: 0.10.0
libtpu: 0.0.40
codegen_flags: <defaults>
</compile_context>

<pallas_src>
import jax
import jax.numpy as jnp
from jax import lax
from jax.experimental import pallas as pl
from jax.experimental.pallas import tpu as pltpu


def _round_up(x, m):
    return ((x + m - 1) // m) * m


# ----------------------------------------------------------------------------
# Fused kernel: rasterize + interpolate + texture + shade   (per batch item)
# ----------------------------------------------------------------------------
def _make_render_kernel(H, W, Fp, Ht, Wt, Htp, Wtp, ambient_ratio, shading):
    HW = H * W
    nb = Fp // 8                      # face blocks of 8 (one block per sublane set)
    f32 = jnp.float32
    bf16 = jnp.bfloat16

    def kernel(geom_ref, light_ref, attr_ref, tex_ref, out_ref):
        # ---- pixel centers (lane-dense, p = row*W + col) --------------------
        pidx = lax.broadcasted_iota(jnp.int32, (1, HW), 1).astype(f32)
        q = jnp.floor(pidx * (1.0 / W))
        r = pidx - q * W
        # one-step correction for float-division rounding (robust for any W)
        q = q + jnp.where(r >= W, 1.0, 0.0) - jnp.where(r < 0.0, 1.0, 0.0)
        r = pidx - q * W
        px = r + 0.5                                   # (1, HW)
        py = q + 0.5                                   # (1, HW)

        # ---- rasterizer: 8 faces per iteration, dense (8, HW) slabs ---------
        def block_body(fb, carry):
            bz, bw0, bw1, bfid = carry
            base = pl.multiple_of(fb * 8, 8)
            g = geom_ref[pl.ds(base, 8), :]            # (8, 9) faces x coords
            x0 = g[:, 0:1]; y0 = g[:, 1:2]; z0 = g[:, 2:3]
            x1 = g[:, 3:4]; y1 = g[:, 4:5]; z1 = g[:, 5:6]
            x2 = g[:, 6:7]; y2 = g[:, 7:8]; z2 = g[:, 8:9]
            area = (x1 - x0) * (y2 - y0) - (x2 - x0) * (y1 - y0)      # (8, 1)
            valid = jnp.abs(area) > 1e-9
            inv_area = jnp.where(valid, 1.0, 0.0) / jnp.where(valid, area, 1.0)
            dx0 = x0 - px; dy0 = y0 - py               # (8, HW) via broadcast
            dx1 = x1 - px; dy1 = y1 - py
            dx2 = x2 - px; dy2 = y2 - py
            # screen-space barycentrics (w0 -> vertex0, w1 -> vertex1)
            w0 = (dx1 * dy2 - dx2 * dy1) * inv_area
            w1 = (dx2 * dy0 - dx0 * dy2) * inv_area
            w2 = 1.0 - w0 - w1
            inside = (w0 >= 0.0) & (w1 >= 0.0) & (w2 >= 0.0) & valid
            z = w0 * z0 + w1 * z1 + w2 * z2
            fid = ((fb * 8).astype(f32)
                   + lax.broadcasted_iota(jnp.int32, (8, HW), 0).astype(f32))
            upd = inside & (z < bz)
            return (jnp.where(upd, z, bz),
                    jnp.where(upd, w0, bw0),
                    jnp.where(upd, w1, bw1),
                    jnp.where(upd, fid, bfid))

        init = (jnp.full((8, HW), 1e30, f32),
                jnp.zeros((8, HW), f32),
                jnp.zeros((8, HW), f32),
                jnp.full((8, HW), -1.0, f32))
        unroll = True if nb <= 8 else 8                # cap unroll for big meshes
        bz, bw0, bw1, bfid = lax.fori_loop(0, nb, block_body, init,
                                           unroll=unroll)

        # ---- resolve the per-sublane winners (once, after the loop) ---------
        BIGF = 1e9
        zmin = jnp.min(bz, axis=0, keepdims=True)              # (1, HW)
        covered = (bfid >= 0.0) & (bz == zmin)                  # (8, HW)
        win_fid = jnp.min(jnp.where(covered, bfid, BIGF),
                          axis=0, keepdims=True)                # (1, HW)
        onewin = covered & (bfid == win_fid)                    # exactly one/pixel
        w0 = jnp.sum(jnp.where(onewin, bw0, 0.0), axis=0, keepdims=True)
        w1 = jnp.sum(jnp.where(onewin, bw1, 0.0), axis=0, keepdims=True)
        w2 = 1.0 - w0 - w1
        alpha = (win_fid < BIGF).astype(f32)           # == interpolate(ones_like)

        # ---- winning-face attribute fetch: one-hot @ attr on the MXU --------
        f_iota = lax.broadcasted_iota(jnp.int32, (Fp, HW), 0).astype(f32)
        onehot = (f_iota == win_fid).astype(f32)       # all-zero for background
        sel = jnp.dot(attr_ref[...], onehot,
                      preferred_element_type=f32)      # (24, HW)
        # attr rows: 8 per vertex = [nx, ny, nz, u, v, 1/w_clip, 0, 0]

        # perspective-correct barycentrics:  b_i = (w_i / w_clip_i) / sum
        pw0 = w0 * sel[5:6]
        pw1 = w1 * sel[13:14]
        pw2 = w2 * sel[21:22]
        denom = pw0 + pw1 + pw2                        # > 0 iff covered
        denom_safe = jnp.where(denom != 0.0, denom, 1.0)
        inv_d = pl.reciprocal(denom_safe, approx=True)
        inv_d = inv_d * (2.0 - denom_safe * inv_d)     # one Newton step
        pw0 = pw0 * inv_d
        pw1 = pw1 * inv_d
        pw2 = pw2 * inv_d

        # grouped interpolation of normal (rows 0-2) and uv (rows 3-4)
        interp = pw0 * sel[0:8] + pw1 * sel[8:16] + pw2 * sel[16:24]  # (8, HW)
        n = interp[0:3]                                               # (3, HW)

        # ---- albedo: separable bilinear fetch (wy on MXU, wx on VPU) --------
        if shading != 'normal':
            u = interp[3:4]
            vv = interp[4:5]
            x = u * Wt - 0.5
            y = vv * Ht - 0.5
            x0f = jnp.floor(x); fx = x - x0f
            y0f = jnp.floor(y); fy = y - y0f
            x0c = jnp.clip(x0f, 0.0, Wt - 1.0)
            x1c = jnp.clip(x0f + 1.0, 0.0, Wt - 1.0)
            y0c = jnp.clip(y0f, 0.0, Ht - 1.0)
            y1c = jnp.clip(y0f + 1.0, 0.0, Ht - 1.0)
            yi = lax.broadcasted_iota(jnp.int32, (Htp, HW), 0).astype(f32)
            xi = lax.broadcasted_iota(jnp.int32, (Wtp, HW), 0).astype(f32)
            wy = ((yi == y0c).astype(f32) * (1.0 - fy)
                  + (yi == y1c).astype(f32) * fy)                 # (Htp, HW)
            wx = ((xi == x0c).astype(f32) * (1.0 - fx)
                  + (xi == x1c).astype(f32) * fx)                 # (Wtp, HW)
            # tex_ref[(c, x), y] = albedo[y, x, c]  (bf16), contract over y
            alb_x = jnp.dot(tex_ref[...], wy.astype(bf16),
                            preferred_element_type=f32)           # (3*Wtp, HW)
            chans = []
            for c in range(3):
                seg = alb_x[c * Wtp:(c + 1) * Wtp, :]             # (Wtp, HW)
                chans.append(jnp.sum(seg * wx, axis=0, keepdims=True))
            alb = jnp.concatenate(chans, axis=0) * alpha          # (3, HW)
        else:
            alb = None

        # ---- shading ---------------------------------------------------------
        if shading == 'normal':
            color = (n + 1.0) * 0.5
        elif shading == 'albedo':
            color = alb
        else:  # lambertian
            d = (n[0:1] * light_ref[0, 0] + n[1:2] * light_ref[0, 1]
                 + n[2:3] * light_ref[0, 2])
            lam = ambient_ratio + (1.0 - ambient_ratio) * jnp.maximum(d, 0.0)
            color = alb * lam

        color = jnp.clip(color, 0.0, 1.0)                          # (3, HW)
        nrm = jnp.clip((n + 1.0) * 0.5, 0.0, 1.0)                  # (3, HW)
        alpha = jnp.clip(alpha, 0.0, 1.0)                          # (1, HW)
        out_ref[...] = jnp.concatenate(
            [color, nrm, alpha, jnp.zeros((1, HW), f32)], axis=0)  # (8, HW)

    return kernel


# ----------------------------------------------------------------------------
# Renderer.forward equivalent
# ----------------------------------------------------------------------------
def render(v, faces, vn, vt, albedo_tex, mvp, h=16, w=16, light_d=None,
           ambient_ratio=1.0, shading='albedo'):
    """Returns (color [B,h,w,3], normal [B,h,w,3], alpha [B,h,w,1])."""
    f32 = jnp.float32
    B = mvp.shape[0]
    V = v.shape[0]
    F = faces.shape[0]
    Fp = _round_up(F, 8)
    Ht, Wt, _ = albedo_tex.shape
    Htp = _round_up(Ht, 8)
    Wtp = _round_up(Wt, 8)
    HW = h * w
    assert HW % 128 == 0, "h*w must be a multiple of 128 (lane-dense output)"

    # --- vertex clip transform in XLA (tiny 4x4; not worth an MXU kernel) ----
    v4 = jnp.concatenate([v, jnp.ones((V, 1), v.dtype)], axis=-1).astype(f32)
    v_clip = jnp.einsum('ik,bjk->bij', v4, mvp.astype(f32))          # [B,V,4]

    wc = v_clip[..., 3]
    wc_safe = jnp.where(jnp.abs(wc) > 1e-8, wc, 1.0)
    ndc = v_clip[..., :3] / wc_safe[..., None]
    # NOTE: row 0 of the image corresponds to ndc_y = -1 (GL/nvdiffrast bottom-up).
    sx = (ndc[..., 0] * 0.5 + 0.5) * w
    sy = (ndc[..., 1] * 0.5 + 0.5) * h
    sz = ndc[..., 2]
    per_vert = jnp.stack([sx, sy, sz], axis=-1)                      # [B,V,3]
    geom = per_vert[:, faces, :]                                     # [B,F,3,3]
    face_ok = jnp.all(wc[:, faces] > 1e-8, axis=-1)                  # [B,F]
    geom = jnp.where(face_ok[..., None, None], geom, 0.0)            # drop bad faces
    geom = geom.reshape(B, F, 9).astype(f32)
    geom = jnp.pad(geom, ((0, 0), (0, Fp - F), (0, 0)))              # [B,Fp,9]

    # per-face attrs, 8 rows per vertex: [nx, ny, nz, u, v, 1/w_clip, 0, 0]
    rw = jnp.where(jnp.abs(wc) > 1e-8, 1.0 / wc_safe, 0.0)           # [B,V]
    vn_f = vn[faces].astype(f32)                                     # [F,3,3]
    vt_f = vt[faces].astype(f32)                                     # [F,3,2]
    rw_f = rw[:, faces].astype(f32)                                  # [B,F,3]
    blk = jnp.concatenate([
        jnp.broadcast_to(vn_f[None], (B, F, 3, 3)),
        jnp.broadcast_to(vt_f[None], (B, F, 3, 2)),
        rw_f[..., None],
        jnp.zeros((B, F, 3, 2), f32),
    ], axis=-1)                                                      # [B,F,3,8]
    attr = blk.reshape(B, F, 24)
    attr = jnp.pad(attr, ((0, 0), (0, Fp - F), (0, 0)))              # [B,Fp,24]
    attr_t = jnp.transpose(attr, (0, 2, 1))                          # [B,24,Fp]

    # texture laid out (c, x) on sublanes, y on lanes; bf16 for the MXU
    tex_cxy = jnp.transpose(albedo_tex.astype(f32), (2, 1, 0))       # [3,Wt,Ht]
    tex_cxy = jnp.pad(tex_cxy, ((0, 0), (0, Wtp - Wt), (0, Htp - Ht)))
    tex_cw = tex_cxy.reshape(3 * Wtp, Htp).astype(jnp.bfloat16)      # [3*Wtp,Htp]

    if light_d is None:
        light_d = jnp.array([0.0, 0.0, 1.0], f32)
    light = jnp.reshape(light_d, (1, 3)).astype(f32)

    kernel = _make_render_kernel(h, w, Fp, Ht, Wt, Htp, Wtp,
                                 float(ambient_ratio), shading)

    out = pl.pallas_call(
        kernel,
        out_shape=jax.ShapeDtypeStruct((B, 8, HW), f32),   # rows: color3 normal3 alpha1 pad1
        grid=(B,),
        in_specs=[
            pl.BlockSpec((None, Fp, 9), lambda b: (b, 0, 0)),        # geom  (VMEM)
            pl.BlockSpec(memory_space=pltpu.MemorySpace.SMEM),       # light [1,3]
            pl.BlockSpec((None, 24, Fp), lambda b: (b, 0, 0)),       # attr
            pl.BlockSpec((3 * Wtp, Htp), lambda b: (0, 0)),          # texture
        ],
        out_specs=pl.BlockSpec((None, 8, HW), lambda b: (b, 0, 0)),
        compiler_params=pltpu.CompilerParams(
            dimension_semantics=("parallel",)),                      # megacore split
    )(geom, light, attr_t, tex_cw)

    # single layout-plumbing transpose back to the PyTorch convention [B,h,w,C]
    img = jnp.transpose(out, (0, 2, 1)).reshape(B, h, w, 8)
    color = img[..., 0:3]
    normal = img[..., 3:6]
    alpha = img[..., 6:7]
    return color, normal, alpha


if __name__ == "__main__":
    key = jax.random.PRNGKey(0)
    kv, kz, kn, kt, ktex = jax.random.split(key, 5)

    B, V, F, H, W = 2, 8, 4, 16, 16

    # deterministic synthetic mesh
    v_xy = jax.random.uniform(kv, (V, 2), minval=-0.8, maxval=0.8)
    v_z = jax.random.uniform(kz, (V, 1), minval=0.1, maxval=0.9)
    v = jnp.concatenate([v_xy, v_z], axis=-1).astype(jnp.float32)          # mesh.v
    faces = jnp.array([[0, 1, 2], [2, 3, 4], [4, 5, 6], [6, 7, 1]],
                      dtype=jnp.int32)                                      # mesh.f
    vn = jax.random.normal(kn, (V, 3), dtype=jnp.float32)
    vn = vn / jnp.linalg.norm(vn, axis=-1, keepdims=True)                   # mesh.vn
    vt = jax.random.uniform(kt, (V, 2), dtype=jnp.float32)                  # mesh.vt
    albedo_tex = jax.random.uniform(ktex, (16, 16, 3), dtype=jnp.float32)   # mesh.albedo

    mvp = jnp.stack([jnp.eye(4, dtype=jnp.float32),
                     jnp.diag(jnp.array([0.9, 1.1, 1.0, 1.0], jnp.float32))])
    light_d = jnp.array([0.3, 0.5, 0.8], jnp.float32)
    light_d = light_d / jnp.linalg.norm(light_d)

    color, normal, alpha = render(v, faces, vn, vt, albedo_tex, mvp,
                                  h=H, w=W, light_d=light_d,
                                  ambient_ratio=0.3, shading='lambertian')
    (color, normal, alpha) = jax.block_until_ready((color, normal, alpha))

    assert color.shape == (B, H, W, 3) and color.dtype == jnp.float32
    assert normal.shape == (B, H, W, 3) and normal.dtype == jnp.float32
    assert alpha.shape == (B, H, W, 1) and alpha.dtype == jnp.float32
    assert bool(jnp.all(jnp.isfinite(color)))
    assert bool(jnp.all(jnp.isfinite(normal)))
    assert bool(jnp.all((alpha >= 0.0) & (alpha <= 1.0)))
    print("KERNEL_OK")
</pallas_src>

<mosaic_0001>
module attributes {stable_mosaic.version = 11 : i64} {
  func.func @kernel(%arg0: i32, %arg1: memref<1x8x9xf32, #tpu.memory_space<vmem>>, %arg2: memref<1x3xf32, #tpu.memory_space<smem>>, %arg3: memref<1x24x8xf32, #tpu.memory_space<vmem>>, %arg4: memref<48x16xbf16, #tpu.memory_space<vmem>>, %arg5: memref<1x8x256xf32, #tpu.memory_space<vmem>>) attributes {dimension_semantics = [#tpu.dimension_semantics<parallel>], iteration_bounds = array<i64: 2>, scalar_prefetch = 0 : i64, scratch_operands = 0 : i64, tpu.core_type = #tpu.core_type<tc>, window_params = [{transform_indices = @transform_0, window_bounds = array<i64: 1, 8, 9>}, {transform_indices = @transform_1, window_bounds = array<i64: 1, 3>}, {transform_indices = @transform_2, window_bounds = array<i64: 1, 24, 8>}, {pipeline_mode = #tpu.pipeline_mode<synchronous>, transform_indices = @transform_3, window_bounds = array<i64: 48, 16>}, {transform_indices = @transform_4, window_bounds = array<i64: 1, 8, 256>}]} {
    %0 = tpu.iota {dimensions = array<i32: 1>} : vector<1x256xi32>
    %1 = arith.sitofp %0 : vector<1x256xi32> to vector<1x256xf32>
    %cst = arith.constant 6.250000e-02 : f32
    %2 = vector.broadcast %cst : f32 to vector<1x256xf32>
    %3 = arith.mulf %1, %2 : vector<1x256xf32>
    %4 = math.floor %3 : vector<1x256xf32>
    %cst_0 = arith.constant 1.600000e+01 : f32
    %5 = vector.broadcast %cst_0 : f32 to vector<1x256xf32>
    %6 = arith.mulf %4, %5 : vector<1x256xf32>
    %7 = arith.subf %1, %6 : vector<1x256xf32>
    %cst_1 = arith.constant 1.600000e+01 : f32
    %8 = vector.broadcast %cst_1 : f32 to vector<1x256xf32>
    %9 = arith.cmpf oge, %7, %8 : vector<1x256xf32>
    %cst_2 = arith.constant 1.000000e+00 : f32
    %cst_3 = arith.constant 0.000000e+00 : f32
    %10 = vector.broadcast %cst_2 : f32 to vector<1x256xf32>
    %11 = vector.broadcast %cst_3 : f32 to vector<1x256xf32>
    %12 = arith.select %9, %10, %11 : vector<1x256xi1>, vector<1x256xf32>
    %13 = arith.addf %4, %12 : vector<1x256xf32>
    %cst_4 = arith.constant 0.000000e+00 : f32
    %14 = vector.broadcast %cst_4 : f32 to vector<1x256xf32>
    %15 = arith.cmpf olt, %7, %14 : vector<1x256xf32>
    %cst_5 = arith.constant 1.000000e+00 : f32
    %cst_6 = arith.constant 0.000000e+00 : f32
    %16 = vector.broadcast %cst_5 : f32 to vector<1x256xf32>
    %17 = vector.broadcast %cst_6 : f32 to vector<1x256xf32>
    %18 = arith.select %15, %16, %17 : vector<1x256xi1>, vector<1x256xf32>
    %19 = arith.subf %13, %18 : vector<1x256xf32>
    %cst_7 = arith.constant 1.600000e+01 : f32
    %20 = vector.broadcast %cst_7 : f32 to vector<1x256xf32>
    %21 = arith.mulf %19, %20 : vector<1x256xf32>
    %22 = arith.subf %1, %21 : vector<1x256xf32>
    %cst_8 = arith.constant 5.000000e-01 : f32
    %23 = vector.broadcast %cst_8 : f32 to vector<1x256xf32>
    %24 = arith.addf %22, %23 : vector<1x256xf32>
    %cst_9 = arith.constant 5.000000e-01 : f32
    %25 = vector.broadcast %cst_9 : f32 to vector<1x256xf32>
    %26 = arith.addf %19, %25 : vector<1x256xf32>
    %cst_10 = arith.constant 1.000000e+30 : f32
    %27 = vector.broadcast %cst_10 : f32 to vector<8x256xf32>
    %cst_11 = arith.constant 0.000000e+00 : f32
    %28 = vector.broadcast %cst_11 : f32 to vector<8x256xf32>
    %cst_12 = arith.constant 0.000000e+00 : f32
    %29 = vector.broadcast %cst_12 : f32 to vector<8x256xf32>
    %cst_13 = arith.constant -1.000000e+00 : f32
    %30 = vector.broadcast %cst_13 : f32 to vector<8x256xf32>
    %c0_i32 = arith.constant 0 : i32
    %c8_i32 = arith.constant 8 : i32
    %31 = arith.muli %c0_i32, %c8_i32 : i32
    %32 = tpu.assume_multiple %31, 8 : i32
    %c0 = arith.constant 0 : index
    %33 = arith.index_cast %32 : i32 to index
    %c0_14 = arith.constant 0 : index
    %34 = vector.load %arg1[%c0, %33, %c0_14] : memref<1x8x9xf32, #tpu.memory_space<vmem>>, vector<1x8x9xf32>
    %35 = vector.shape_cast %34 : vector<1x8x9xf32> to vector<8x9xf32>
    %36 = vector.extract_strided_slice %35 {offsets = [0, 0], sizes = [8, 1], strides = [1, 1]} : vector<8x9xf32> to vector<8x1xf32>
    %37 = vector.extract_strided_slice %35 {offsets = [0, 1], sizes = [8, 1], strides = [1, 1]} : vector<8x9xf32> to vector<8x1xf32>
    %38 = vector.extract_strided_slice %35 {offsets = [0, 2], sizes = [8, 1], strides = [1, 1]} : vector<8x9xf32> to vector<8x1xf32>
    %39 = vector.extract_strided_slice %35 {offsets = [0, 3], sizes = [8, 1], strides = [1, 1]} : vector<8x9xf32> to vector<8x1xf32>
    %40 = vector.extract_strided_slice %35 {offsets = [0, 4], sizes = [8, 1], strides = [1, 1]} : vector<8x9xf32> to vector<8x1xf32>
    %41 = vector.extract_strided_slice %35 {offsets = [0, 5], sizes = [8, 1], strides = [1, 1]} : vector<8x9xf32> to vector<8x1xf32>
    %42 = vector.extract_strided_slice %35 {offsets = [0, 6], sizes = [8, 1], strides = [1, 1]} : vector<8x9xf32> to vector<8x1xf32>
    %43 = vector.extract_strided_slice %35 {offsets = [0, 7], sizes = [8, 1], strides = [1, 1]} : vector<8x9xf32> to vector<8x1xf32>
    %44 = vector.extract_strided_slice %35 {offsets = [0, 8], sizes = [8, 1], strides = [1, 1]} : vector<8x9xf32> to vector<8x1xf32>
    %45 = arith.subf %39, %36 : vector<8x1xf32>
    %46 = arith.subf %43, %37 : vector<8x1xf32>
    %47 = arith.mulf %45, %46 : vector<8x1xf32>
    %48 = arith.subf %42, %36 : vector<8x1xf32>
    %49 = arith.subf %40, %37 : vector<8x1xf32>
    %50 = arith.mulf %48, %49 : vector<8x1xf32>
    %51 = arith.subf %47, %50 : vector<8x1xf32>
    %52 = math.absf %51 : vector<8x1xf32>
    %cst_15 = arith.constant 9.99999971E-10 : f32
    %53 = vector.broadcast %cst_15 : f32 to vector<8x1xf32>
    %54 = arith.cmpf ogt, %52, %53 : vector<8x1xf32>
    %cst_16 = arith.constant 1.000000e+00 : f32
    %cst_17 = arith.constant 0.000000e+00 : f32
    %55 = vector.broadcast %cst_16 : f32 to vector<8x1xf32>
    %56 = vector.broadcast %cst_17 : f32 to vector<8x1xf32>
    %57 = arith.select %54, %55, %56 : vector<8x1xi1>, vector<8x1xf32>
    %cst_18 = arith.constant 1.000000e+00 : f32
    %58 = vector.broadcast %cst_18 : f32 to vector<8x1xf32>
    %59 = arith.select %54, %51, %58 : vector<8x1xi1>, vector<8x1xf32>
    %60 = arith.divf %57, %59 : vector<8x1xf32>
    %61 = vector.broadcast %36 : vector<8x1xf32> to vector<8x256xf32>
    %62 = vector.broadcast %24 : vector<1x256xf32> to vector<8x256xf32>
    %63 = arith.subf %61, %62 : vector<8x256xf32>
    %64 = vector.broadcast %37 : vector<8x1xf32> to vector<8x256xf32>
    %65 = vector.broadcast %26 : vector<1x256xf32> to vector<8x256xf32>
    %66 = arith.subf %64, %65 : vector<8x256xf32>
    %67 = vector.broadcast %39 : vector<8x1xf32> to vector<8x256xf32>
    %68 = vector.broadcast %24 : vector<1x256xf32> to vector<8x256xf32>
    %69 = arith.subf %67, %68 : vector<8x256xf32>
    %70 = vector.broadcast %40 : vector<8x1xf32> to vector<8x256xf32>
    %71 = vector.broadcast %26 : vector<1x256xf32> to vector<8x256xf32>
    %72 = arith.subf %70, %71 : vector<8x256xf32>
    %73 = vector.broadcast %42 : vector<8x1xf32> to vector<8x256xf32>
    %74 = vector.broadcast %24 : vector<1x256xf32> to vector<8x256xf32>
    %75 = arith.subf %73, %74 : vector<8x256xf32>
    %76 = vector.broadcast %43 : vector<8x1xf32> to vector<8x256xf32>
    %77 = vector.broadcast %26 : vector<1x256xf32> to vector<8x256xf32>
    %78 = arith.subf %76, %77 : vector<8x256xf32>
    %79 = arith.mulf %69, %78 : vector<8x256xf32>
    %80 = arith.mulf %75, %72 : vector<8x256xf32>
    %81 = arith.subf %79, %80 : vector<8x256xf32>
    %82 = vector.broadcast %60 : vector<8x1xf32> to vector<8x256xf32>
    %83 = arith.mulf %81, %82 : vector<8x256xf32>
    %84 = arith.mulf %75, %66 : vector<8x256xf32>
    %85 = arith.mulf %63, %78 : vector<8x256xf32>
    %86 = arith.subf %84, %85 : vector<8x256xf32>
    %87 = vector.broadcast %60 : vector<8x1xf32> to vector<8x256xf32>
    %88 = arith.mulf %86, %87 : vector<8x256xf32>
    %cst_19 = arith.constant 1.000000e+00 : f32
    %89 = vector.broadcast %cst_19 : f32 to vector<8x256xf32>
    %90 = arith.subf %89, %83 : vector<8x256xf32>
    %91 = arith.subf %90, %88 : vector<8x256xf32>
    %cst_20 = arith.constant 0.000000e+00 : f32
    %92 = vector.broadcast %cst_20 : f32 to vector<8x256xf32>
    %93 = arith.cmpf oge, %83, %92 : vector<8x256xf32>
    %cst_21 = arith.constant 0.000000e+00 : f32
    %94 = vector.broadcast %cst_21 : f32 to vector<8x256xf32>
    %95 = arith.cmpf oge, %88, %94 : vector<8x256xf32>
    %96 = arith.andi %93, %95 : vector<8x256xi1>
    %cst_22 = arith.constant 0.000000e+00 : f32
    %97 = vector.broadcast %cst_22 : f32 to vector<8x256xf32>
    %98 = arith.cmpf oge, %91, %97 : vector<8x256xf32>
    %99 = arith.andi %96, %98 : vector<8x256xi1>
    %100 = vector.broadcast %54 : vector<8x1xi1> to vector<8x256xi1>
    %101 = arith.andi %99, %100 : vector<8x256xi1>
    %102 = vector.broadcast %38 : vector<8x1xf32> to vector<8x256xf32>
    %103 = arith.mulf %83, %102 : vector<8x256xf32>
    %104 = vector.broadcast %41 : vector<8x1xf32> to vector<8x256xf32>
    %105 = arith.mulf %88, %104 : vector<8x256xf32>
    %106 = arith.addf %103, %105 : vector<8x256xf32>
    %107 = vector.broadcast %44 : vector<8x1xf32> to vector<8x256xf32>
    %108 = arith.mulf %91, %107 : vector<8x256xf32>
    %109 = arith.addf %106, %108 : vector<8x256xf32>
    %c8_i32_23 = arith.constant 8 : i32
    %110 = arith.muli %c0_i32, %c8_i32_23 : i32
    %111 = arith.sitofp %110 : i32 to f32
    %112 = tpu.iota {dimensions = array<i32: 0>} : vector<8x256xi32>
    %113 = arith.sitofp %112 : vector<8x256xi32> to vector<8x256xf32>
    %114 = vector.broadcast %111 : f32 to vector<8x256xf32>
    %115 = arith.addf %114, %113 : vector<8x256xf32>
    %116 = arith.cmpf olt, %109, %27 : vector<8x256xf32>
    %117 = arith.andi %101, %116 : vector<8x256xi1>
    %118 = arith.select %117, %109, %27 : vector<8x256xi1>, vector<8x256xf32>
    %119 = arith.select %117, %83, %28 : vector<8x256xi1>, vector<8x256xf32>
    %120 = arith.select %117, %88, %29 : vector<8x256xi1>, vector<8x256xf32>
    %121 = arith.select %117, %115, %30 : vector<8x256xi1>, vector<8x256xf32>
    %c1_i32 = arith.constant 1 : i32
    %cst_24 = arith.constant dense<0x7F800000> : vector<256xf32>
    %122 = vector.multi_reduction <minimumf>, %118, %cst_24 [0] : vector<8x256xf32> to vector<256xf32>
    %123 = vector.shape_cast %122 : vector<256xf32> to vector<1x256xf32>
    %cst_25 = arith.constant 0.000000e+00 : f32
    %124 = vector.broadcast %cst_25 : f32 to vector<8x256xf32>
    %125 = arith.cmpf oge, %121, %124 : vector<8x256xf32>
    %126 = vector.broadcast %123 : vector<1x256xf32> to vector<8x256xf32>
    %127 = arith.cmpf oeq, %118, %126 : vector<8x256xf32>
    %128 = arith.andi %125, %127 : vector<8x256xi1>
    %cst_26 = arith.constant 1.000000e+09 : f32
    %129 = vector.broadcast %cst_26 : f32 to vector<8x256xf32>
    %130 = arith.select %128, %121, %129 : vector<8x256xi1>, vector<8x256xf32>
    %cst_27 = arith.constant dense<0x7F800000> : vector<256xf32>
    %131 = vector.multi_reduction <minimumf>, %130, %cst_27 [0] : vector<8x256xf32> to vector<256xf32>
    %132 = vector.shape_cast %131 : vector<256xf32> to vector<1x256xf32>
    %133 = vector.broadcast %132 : vector<1x256xf32> to vector<8x256xf32>
    %134 = arith.cmpf oeq, %121, %133 : vector<8x256xf32>
    %135 = arith.andi %128, %134 : vector<8x256xi1>
    %cst_28 = arith.constant 0.000000e+00 : f32
    %136 = vector.broadcast %cst_28 : f32 to vector<8x256xf32>
    %137 = arith.select %135, %119, %136 : vector<8x256xi1>, vector<8x256xf32>
    %cst_29 = arith.constant dense<0.000000e+00> : vector<256xf32>
    %138 = vector.multi_reduction <add>, %137, %cst_29 [0] : vector<8x256xf32> to vector<256xf32>
    %139 = vector.shape_cast %138 : vector<256xf32> to vector<1x256xf32>
    %cst_30 = arith.constant 0.000000e+00 : f32
    %140 = vector.broadcast %cst_30 : f32 to vector<8x256xf32>
    %141 = arith.select %135, %120, %140 : vector<8x256xi1>, vector<8x256xf32>
    %cst_31 = arith.constant dense<0.000000e+00> : vector<256xf32>
    %142 = vector.multi_reduction <add>, %141, %cst_31 [0] : vector<8x256xf32> to vector<256xf32>
    %143 = vector.shape_cast %142 : vector<256xf32> to vector<1x256xf32>
    %cst_32 = arith.constant 1.000000e+00 : f32
    %144 = vector.broadcast %cst_32 : f32 to vector<1x256xf32>
    %145 = arith.subf %144, %139 : vector<1x256xf32>
    %146 = arith.subf %145, %143 : vector<1x256xf32>
    %cst_33 = arith.constant 1.000000e+09 : f32
    %147 = vector.broadcast %cst_33 : f32 to vector<1x256xf32>
    %148 = arith.cmpf olt, %132, %147 : vector<1x256xf32>
    %149 = arith.extui %148 : vector<1x256xi1> to vector<1x256xi32>
    %150 = arith.sitofp %149 : vector<1x256xi32> to vector<1x256xf32>
    %151 = tpu.iota {dimensions = array<i32: 0>} : vector<8x256xi32>
    %152 = arith.sitofp %151 : vector<8x256xi32> to vector<8x256xf32>
    %153 = vector.broadcast %132 : vector<1x256xf32> to vector<8x256xf32>
    %154 = arith.cmpf oeq, %152, %153 : vector<8x256xf32>
    %155 = arith.extui %154 : vector<8x256xi1> to vector<8x256xi32>
    %156 = arith.sitofp %155 : vector<8x256xi32> to vector<8x256xf32>
    %c0_34 = arith.constant 0 : index
    %c0_35 = arith.constant 0 : index
    %c0_36 = arith.constant 0 : index
    %157 = vector.load %arg3[%c0_34, %c0_35, %c0_36] : memref<1x24x8xf32, #tpu.memory_space<vmem>>, vector<1x24x8xf32>
    %158 = vector.shape_cast %157 : vector<1x24x8xf32> to vector<24x8xf32>
    %cst_37 = arith.constant dense<0.000000e+00> : vector<24x256xf32>
    %159 = tpu.matmul %158, %156, %cst_37 {dimension_numbers = #tpu.dot_dimension_numbers<[1], [0], [0], [1], [0, 0, 1, 1], [], []>} : vector<24x8xf32>, vector<8x256xf32>, vector<24x256xf32> -> vector<24x256xf32>
    %160 = vector.extract_strided_slice %159 {offsets = [5, 0], sizes = [1, 256], strides = [1, 1]} : vector<24x256xf32> to vector<1x256xf32>
    %161 = arith.mulf %139, %160 : vector<1x256xf32>
    %162 = vector.extract_strided_slice %159 {offsets = [13, 0], sizes = [1, 256], strides = [1, 1]} : vector<24x256xf32> to vector<1x256xf32>
    %163 = arith.mulf %143, %162 : vector<1x256xf32>
    %164 = vector.extract_strided_slice %159 {offsets = [21, 0], sizes = [1, 256], strides = [1, 1]} : vector<24x256xf32> to vector<1x256xf32>
    %165 = arith.mulf %146, %164 : vector<1x256xf32>
    %166 = arith.addf %161, %163 : vector<1x256xf32>
    %167 = arith.addf %166, %165 : vector<1x256xf32>
    %cst_38 = arith.constant 0.000000e+00 : f32
    %168 = vector.broadcast %cst_38 : f32 to vector<1x256xf32>
    %169 = arith.cmpf one, %167, %168 : vector<1x256xf32>
    %cst_39 = arith.constant 1.000000e+00 : f32
    %170 = vector.broadcast %cst_39 : f32 to vector<1x256xf32>
    %171 = arith.select %169, %167, %170 : vector<1x256xi1>, vector<1x256xf32>
    %172 = tpu.reciprocal %171 {approx = true} : vector<1x256xf32> -> vector<1x256xf32>
    %173 = arith.mulf %171, %172 : vector<1x256xf32>
    %cst_40 = arith.constant 2.000000e+00 : f32
    %174 = vector.broadcast %cst_40 : f32 to vector<1x256xf32>
    %175 = arith.subf %174, %173 : vector<1x256xf32>
    %176 = arith.mulf %172, %175 : vector<1x256xf32>
    %177 = arith.mulf %161, %176 : vector<1x256xf32>
    %178 = arith.mulf %163, %176 : vector<1x256xf32>
    %179 = arith.mulf %165, %176 : vector<1x256xf32>
    %180 = vector.extract_strided_slice %159 {offsets = [0, 0], sizes = [8, 256], strides = [1, 1]} : vector<24x256xf32> to vector<8x256xf32>
    %181 = vector.broadcast %177 : vector<1x256xf32> to vector<8x256xf32>
    %182 = arith.mulf %181, %180 : vector<8x256xf32>
    %183 = vector.extract_strided_slice %159 {offsets = [8, 0], sizes = [8, 256], strides = [1, 1]} : vector<24x256xf32> to vector<8x256xf32>
    %184 = vector.broadcast %178 : vector<1x256xf32> to vector<8x256xf32>
    %185 = arith.mulf %184, %183 : vector<8x256xf32>
    %186 = arith.addf %182, %185 : vector<8x256xf32>
    %187 = vector.extract_strided_slice %159 {offsets = [16, 0], sizes = [8, 256], strides = [1, 1]} : vector<24x256xf32> to vector<8x256xf32>
    %188 = vector.broadcast %179 : vector<1x256xf32> to vector<8x256xf32>
    %189 = arith.mulf %188, %187 : vector<8x256xf32>
    %190 = arith.addf %186, %189 : vector<8x256xf32>
    %191 = vector.extract_strided_slice %190 {offsets = [0, 0], sizes = [3, 256], strides = [1, 1]} : vector<8x256xf32> to vector<3x256xf32>
    %192 = vector.extract_strided_slice %190 {offsets = [3, 0], sizes = [1, 256], strides = [1, 1]} : vector<8x256xf32> to vector<1x256xf32>
    %193 = vector.extract_strided_slice %190 {offsets = [4, 0], sizes = [1, 256], strides = [1, 1]} : vector<8x256xf32> to vector<1x256xf32>
    %cst_41 = arith.constant 1.600000e+01 : f32
    %194 = vector.broadcast %cst_41 : f32 to vector<1x256xf32>
    %195 = arith.mulf %192, %194 : vector<1x256xf32>
    %cst_42 = arith.constant 5.000000e-01 : f32
    %196 = vector.broadcast %cst_42 : f32 to vector<1x256xf32>
    %197 = arith.subf %195, %196 : vector<1x256xf32>
    %cst_43 = arith.constant 1.600000e+01 : f32
    %198 = vector.broadcast %cst_43 : f32 to vector<1x256xf32>
    %199 = arith.mulf %193, %198 : vector<1x256xf32>
    %cst_44 = arith.constant 5.000000e-01 : f32
    %200 = vector.broadcast %cst_44 : f32 to vector<1x256xf32>
    %201 = arith.subf %199, %200 : vector<1x256xf32>
    %202 = math.floor %197 : vector<1x256xf32>
    %203 = arith.subf %197, %202 : vector<1x256xf32>
    %204 = math.floor %201 : vector<1x256xf32>
    %205 = arith.subf %201, %204 : vector<1x256xf32>
    %cst_45 = arith.constant 0.000000e+00 : f32
    %cst_46 = arith.constant 1.500000e+01 : f32
    %206 = vector.broadcast %cst_45 : f32 to vector<1x256xf32>
    %207 = arith.maximumf %206, %202 : vector<1x256xf32>
    %208 = vector.broadcast %cst_46 : f32 to vector<1x256xf32>
    %209 = arith.minimumf %208, %207 : vector<1x256xf32>
    %cst_47 = arith.constant 1.000000e+00 : f32
    %210 = vector.broadcast %cst_47 : f32 to vector<1x256xf32>
    %211 = arith.addf %202, %210 : vector<1x256xf32>
    %cst_48 = arith.constant 0.000000e+00 : f32
    %cst_49 = arith.constant 1.500000e+01 : f32
    %212 = vector.broadcast %cst_48 : f32 to vector<1x256xf32>
    %213 = arith.maximumf %212, %211 : vector<1x256xf32>
    %214 = vector.broadcast %cst_49 : f32 to vector<1x256xf32>
    %215 = arith.minimumf %214, %213 : vector<1x256xf32>
    %cst_50 = arith.constant 0.000000e+00 : f32
    %cst_51 = arith.constant 1.500000e+01 : f32
    %216 = vector.broadcast %cst_50 : f32 to vector<1x256xf32>
    %217 = arith.maximumf %216, %204 : vector<1x256xf32>
    %218 = vector.broadcast %cst_51 : f32 to vector<1x256xf32>
    %219 = arith.minimumf %218, %217 : vector<1x256xf32>
    %cst_52 = arith.constant 1.000000e+00 : f32
    %220 = vector.broadcast %cst_52 : f32 to vector<1x256xf32>
    %221 = arith.addf %204, %220 : vector<1x256xf32>
    %cst_53 = arith.constant 0.000000e+00 : f32
    %cst_54 = arith.constant 1.500000e+01 : f32
    %222 = vector.broadcast %cst_53 : f32 to vector<1x256xf32>
    %223 = arith.maximumf %222, %221 : vector<1x256xf32>
    %224 = vector.broadcast %cst_54 : f32 to vector<1x256xf32>
    %225 = arith.minimumf %224, %223 : vector<1x256xf32>
    %226 = tpu.iota {dimensions = array<i32: 0>} : vector<16x256xi32>
    %227 = arith.sitofp %226 : vector<16x256xi32> to vector<16x256xf32>
    %228 = tpu.iota {dimensions = array<i32: 0>} : vector<16x256xi32>
    %229 = arith.sitofp %228 : vector<16x256xi32> to vector<16x256xf32>
    %230 = vector.broadcast %219 : vector<1x256xf32> to vector<16x256xf32>
    %231 = arith.cmpf oeq, %227, %230 : vector<16x256xf32>
    %232 = arith.extui %231 : vector<16x256xi1> to vector<16x256xi32>
    %233 = arith.sitofp %232 : vector<16x256xi32> to vector<16x256xf32>
    %cst_55 = arith.constant 1.000000e+00 : f32
    %234 = vector.broadcast %cst_55 : f32 to vector<1x256xf32>
    %235 = arith.subf %234, %205 : vector<1x256xf32>
    %236 = vector.broadcast %235 : vector<1x256xf32> to vector<16x256xf32>
    %237 = arith.mulf %233, %236 : vector<16x256xf32>
    %238 = vector.broadcast %225 : vector<1x256xf32> to vector<16x256xf32>
    %239 = arith.cmpf oeq, %227, %238 : vector<16x256xf32>
    %240 = arith.extui %239 : vector<16x256xi1> to vector<16x256xi32>
    %241 = arith.sitofp %240 : vector<16x256xi32> to vector<16x256xf32>
    %242 = vector.broadcast %205 : vector<1x256xf32> to vector<16x256xf32>
    %243 = arith.mulf %241, %242 : vector<16x256xf32>
    %244 = arith.addf %237, %243 : vector<16x256xf32>
    %245 = vector.broadcast %209 : vector<1x256xf32> to vector<16x256xf32>
    %246 = arith.cmpf oeq, %229, %245 : vector<16x256xf32>
    %247 = arith.extui %246 : vector<16x256xi1> to vector<16x256xi32>
    %248 = arith.sitofp %247 : vector<16x256xi32> to vector<16x256xf32>
    %cst_56 = arith.constant 1.000000e+00 : f32
    %249 = vector.broadcast %cst_56 : f32 to vector<1x256xf32>
    %250 = arith.subf %249, %203 : vector<1x256xf32>
    %251 = vector.broadcast %250 : vector<1x256xf32> to vector<16x256xf32>
    %252 = arith.mulf %248, %251 : vector<16x256xf32>
    %253 = vector.broadcast %215 : vector<1x256xf32> to vector<16x256xf32>
    %254 = arith.cmpf oeq, %229, %253 : vector<16x256xf32>
    %255 = arith.extui %254 : vector<16x256xi1> to vector<16x256xi32>
    %256 = arith.sitofp %255 : vector<16x256xi32> to vector<16x256xf32>
    %257 = vector.broadcast %203 : vector<1x256xf32> to vector<16x256xf32>
    %258 = arith.mulf %256, %257 : vector<16x256xf32>
    %259 = arith.addf %252, %258 : vector<16x256xf32>
    %c0_57 = arith.constant 0 : index
    %c0_58 = arith.constant 0 : index
    %260 = vector.load %arg4[%c0_57, %c0_58] : memref<48x16xbf16, #tpu.memory_space<vmem>>, vector<48x16xbf16>
    %261 = arith.truncf %244 : vector<16x256xf32> to vector<16x256xbf16>
    %cst_59 = arith.constant dense<0.000000e+00> : vector<48x256xf32>
    %262 = tpu.matmul %260, %261, %cst_59 {dimension_numbers = #tpu.dot_dimension_numbers<[1], [0], [0], [1], [0, 0, 1, 1], [], []>} : vector<48x16xbf16>, vector<16x256xbf16>, vector<48x256xf32> -> vector<48x256xf32>
    %263 = vector.extract_strided_slice %262 {offsets = [0, 0], sizes = [16, 256], strides = [1, 1]} : vector<48x256xf32> to vector<16x256xf32>
    %264 = arith.mulf %263, %259 : vector<16x256xf32>
    %cst_60 = arith.constant dense<0.000000e+00> : vector<256xf32>
    %265 = vector.multi_reduction <add>, %264, %cst_60 [0] : vector<16x256xf32> to vector<256xf32>
    %266 = vector.shape_cast %265 : vector<256xf32> to vector<1x256xf32>
    %267 = vector.extract_strided_slice %262 {offsets = [16, 0], sizes = [16, 256], strides = [1, 1]} : vector<48x256xf32> to vector<16x256xf32>
    %268 = arith.mulf %267, %259 : vector<16x256xf32>
    %cst_61 = arith.constant dense<0.000000e+00> : vector<256xf32>
    %269 = vector.multi_reduction <add>, %268, %cst_61 [0] : vector<16x256xf32> to vector<256xf32>
    %270 = vector.shape_cast %269 : vector<256xf32> to vector<1x256xf32>
    %271 = vector.extract_strided_slice %262 {offsets = [32, 0], sizes = [16, 256], strides = [1, 1]} : vector<48x256xf32> to vector<16x256xf32>
    %272 = arith.mulf %271, %259 : vector<16x256xf32>
    %cst_62 = arith.constant dense<0.000000e+00> : vector<256xf32>
    %273 = vector.multi_reduction <add>, %272, %cst_62 [0] : vector<16x256xf32> to vector<256xf32>
    %274 = vector.shape_cast %273 : vector<256xf32> to vector<1x256xf32>
    %275 = tpu.concatenate %266, %270, %274 in 0 : vector<1x256xf32>, vector<1x256xf32>, vector<1x256xf32> -> vector<3x256xf32>
    %276 = vector.broadcast %150 : vector<1x256xf32> to vector<3x256xf32>
    %277 = arith.mulf %275, %276 : vector<3x256xf32>
    %278 = vector.extract_strided_slice %191 {offsets = [0, 0], sizes = [1, 256], strides = [1, 1]} : vector<3x256xf32> to vector<1x256xf32>
    %c0_63 = arith.constant 0 : index
    %c0_64 = arith.constant 0 : index
    %279 = memref.load %arg2[%c0_63, %c0_64] : memref<1x3xf32, #tpu.memory_space<smem>>
    %280 = vector.broadcast %279 : f32 to vector<1x256xf32>
    %281 = arith.mulf %278, %280 : vector<1x256xf32>
    %282 = vector.extract_strided_slice %191 {offsets = [1, 0], sizes = [1, 256], strides = [1, 1]} : vector<3x256xf32> to vector<1x256xf32>
    %c0_65 = arith.constant 0 : index
    %c1 = arith.constant 1 : index
    %283 = memref.load %arg2[%c0_65, %c1] : memref<1x3xf32, #tpu.memory_space<smem>>
    %284 = vector.broadcast %283 : f32 to vector<1x256xf32>
    %285 = arith.mulf %282, %284 : vector<1x256xf32>
    %286 = arith.addf %281, %285 : vector<1x256xf32>
    %287 = vector.extract_strided_slice %191 {offsets = [2, 0], sizes = [1, 256], strides = [1, 1]} : vector<3x256xf32> to vector<1x256xf32>
    %c0_66 = arith.constant 0 : index
    %c2 = arith.constant 2 : index
    %288 = memref.load %arg2[%c0_66, %c2] : memref<1x3xf32, #tpu.memory_space<smem>>
    %289 = vector.broadcast %288 : f32 to vector<1x256xf32>
    %290 = arith.mulf %287, %289 : vector<1x256xf32>
    %291 = arith.addf %286, %290 : vector<1x256xf32>
    %cst_67 = arith.constant 0.000000e+00 : f32
    %292 = vector.broadcast %cst_67 : f32 to vector<1x256xf32>
    %293 = arith.maximumf %291, %292 : vector<1x256xf32>
    %cst_68 = arith.constant 0.699999988 : f32
    %294 = vector.broadcast %cst_68 : f32 to vector<1x256xf32>
    %295 = arith.mulf %294, %293 : vector<1x256xf32>
    %cst_69 = arith.constant 3.000000e-01 : f32
    %296 = vector.broadcast %cst_69 : f32 to vector<1x256xf32>
    %297 = arith.addf %296, %295 : vector<1x256xf32>
    %298 = vector.broadcast %297 : vector<1x256xf32> to vector<3x256xf32>
    %299 = arith.mulf %277, %298 : vector<3x256xf32>
    %cst_70 = arith.constant 0.000000e+00 : f32
    %cst_71 = arith.constant 1.000000e+00 : f32
    %300 = vector.broadcast %cst_70 : f32 to vector<3x256xf32>
    %301 = arith.maximumf %300, %299 : vector<3x256xf32>
    %302 = vector.broadcast %cst_71 : f32 to vector<3x256xf32>
    %303 = arith.minimumf %302, %301 : vector<3x256xf32>
    %cst_72 = arith.constant 1.000000e+00 : f32
    %304 = vector.broadcast %cst_72 : f32 to vector<3x256xf32>
    %305 = arith.addf %191, %304 : vector<3x256xf32>
    %cst_73 = arith.constant 5.000000e-01 : f32
    %306 = vector.broadcast %cst_73 : f32 to vector<3x256xf32>
    %307 = arith.mulf %305, %306 : vector<3x256xf32>
    %cst_74 = arith.constant 0.000000e+00 : f32
    %cst_75 = arith.constant 1.000000e+00 : f32
    %308 = vector.broadcast %cst_74 : f32 to vector<3x256xf32>
    %309 = arith.maximumf %308, %307 : vector<3x256xf32>
    %310 = vector.broadcast %cst_75 : f32 to vector<3x256xf32>
    %311 = arith.minimumf %310, %309 : vector<3x256xf32>
    %cst_76 = arith.constant 0.000000e+00 : f32
    %cst_77 = arith.constant 1.000000e+00 : f32
    %312 = vector.broadcast %cst_76 : f32 to vector<1x256xf32>
    %313 = arith.maximumf %312, %150 : vector<1x256xf32>
    %314 = vector.broadcast %cst_77 : f32 to vector<1x256xf32>
    %315 = arith.minimumf %314, %313 : vector<1x256xf32>
    %cst_78 = arith.constant 0.000000e+00 : f32
    %316 = vector.broadcast %cst_78 : f32 to vector<1x256xf32>
    %317 = tpu.concatenate %303, %311, %315, %316 in 0 : vector<3x256xf32>, vector<3x256xf32>, vector<1x256xf32>, vector<1x256xf32> -> vector<8x256xf32>
    %c0_79 = arith.constant 0 : index
    %c0_80 = arith.constant 0 : index
    %c0_81 = arith.constant 0 : index
    %318 = vector.load %arg5[%c0_79, %c0_80, %c0_81] : memref<1x8x256xf32, #tpu.memory_space<vmem>>, vector<1x8x256xf32>
    %319 = vector.shape_cast %318 : vector<1x8x256xf32> to vector<8x256xf32>
    %320 = vector.shape_cast %317 : vector<8x256xf32> to vector<1x8x256xf32>
    tpu.vector_store %arg5[%c0_79, %c0_80, %c0_81], %320 {strides = array<i32>} : memref<1x8x256xf32, #tpu.memory_space<vmem>>, vector<1x8x256xf32>,
    return
  }
  func.func @transform_0(%arg0: i32) -> (i32, i32, i32) {
    %c0_i32 = arith.constant 0 : i32
    %c0_i32_0 = arith.constant 0 : i32
    %c0_i32_1 = arith.constant 0 : i32
    return %arg0, %c0_i32, %c0_i32_0 : i32, i32, i32
  }
  func.func @transform_1(%arg0: i32) -> (i32, i32) {
    %c0_i32 = arith.constant 0 : i32
    %c0_i32_0 = arith.constant 0 : i32
    %c0_i32_1 = arith.constant 0 : i32
    return %c0_i32, %c0_i32_0 : i32, i32
  }
  func.func @transform_2(%arg0: i32) -> (i32, i32, i32) {
    %c0_i32 = arith.constant 0 : i32
    %c0_i32_0 = arith.constant 0 : i32
    %c0_i32_1 = arith.constant 0 : i32
    return %arg0, %c0_i32, %c0_i32_0 : i32, i32, i32
  }
  func.func @transform_3(%arg0: i32) -> (i32, i32) {
    %c0_i32 = arith.constant 0 : i32
    %c0_i32_0 = arith.constant 0 : i32
    %c0_i32_1 = arith.constant 0 : i32
    return %c0_i32, %c0_i32_0 : i32, i32
  }
  func.func @transform_4(%arg0: i32) -> (i32, i32, i32) {
    %c0_i32 = arith.constant 0 : i32
    %c0_i32_0 = arith.constant 0 : i32
    %c0_i32_1 = arith.constant 0 : i32
    return %arg0, %c0_i32, %c0_i32_0 : i32, i32, i32
  }
}

</mosaic_0001>

<bundles_post_ra>
// kernel: tpu_custom_call.1
= control target key start
LH: loop header
LB: loop body
LE: loop exit
PB: predicated region body
PF: predicated region fallthrough
CT: control target
= control target key end

     0   :  { %9 = vsyncpa [#allocation4], 0  ;;  %s1717_s0 = inlined_call_operand.vmem [shape: f32[2,8,9], index: 0, kind: input, shape index: {}]   ;;  %s1718_s1 = inlined_call_operand.vmem [shape: f32[1,3], index: 1, kind: input, shape index: {}]   ;;  %s1719_s2 = inlined_call_operand.vmem [shape: f32[2,24,8], index: 2, kind: input, shape index: {}]   ;;  %s1720_s3 = inlined_call_operand.vmem [shape: bf16[48,16], index: 3, kind: input, shape index: {}]   ;;  %s1721_s4 = inlined_call_operand.hbm [shape: f32[2,8,256], index: 4, kind: output, shape index: {}]  }
   0x1   :  { %10 = vsyncpa [#allocation3], 0 }
   0x2   :  { %12 = vsyncpa [#allocation3 + $0x1], 0  ;;  %s1399_s15 = smov 0   ;;  %s1401_s16 = smov 0  }
   0x3   :  { %s1403_s17 = smov 0   ;;  %s1405_s18 = smov 0  }
   0x4 LB: > { %s1420_s19 = sadd.s32 4294967295, %s1354_s18   ;;  %s1137_s20 = sadd.s32 4294967294, %s1354_s18   ;;  %s1354_s18 = sphi %s1405_s18, %s1736_s18   ;;  %s1350_s17 = sphi %s1403_s17, %s1735_s17   ;;  %s1346_s16 = sphi %s1401_s16, %s1734_s16   ;;  %s1342_s15 = sphi %s1399_s15, %s1733_s15  }
   0x5   : > { %s1424_s21 = sadd.s32 1, %s1354_s18   ;;  %s119_s22 = sadd.s32 1, %s1350_s17 }
   0x6   : > { %s116_s23 = ssub.s32 %s1354_s18, %s1424_s21  ;;  %p129_p0 = scmp.ne.s32.totalorder %s1350_s17, %s1346_s16 }
   0x7   : > { %p117_p1 = scmp.eq.s32.totalorder %s116_s23, 0  ;;  %p130_p2 = scmp.eq.s32.totalorder %s1420_s19, 1 }
   0x8   : > { %p135_p3 = scmp.ne.s32.totalorder %s1346_s16, %s1342_s15  ;;  %p136_p4 = scmp.eq.s32.totalorder %s1137_s20, 1 }
   0x9   : > { %s1435_s24 = scalar_select %p117_p1, %s1350_s17, %s119_s22  }
   0xa   : > { %p1437_p5 = por %p130_p2, %p129_p0  ;;  %p1441_p6 = por %p136_p4, %p135_p3 }
   0xb   : > { %p1138_p7 = scmp.ge.s32.totalorder %s1354_s18, 1  ;;  %p143_p8 = scmp.lt.s32.totalorder %s1354_s18, 3 }
   0xc   : > { %p1202_p9 = scmp.eq.s32.totalorder %s1420_s19, 0  ;;  %s156_s30 = sshll.u32 %s1718_s1, 4  ;;  %s157_s30 = int_to_ptr.vmem [resolvable:$true] %s156_s30 }
   0xd   : > { %p1448_p10 = pnand %p1138_p7, %p143_p8  ;;  %s1275_s5 = scalar_lea.vmem %s157_s30, 16 }
   0xe   : > { %p1276_p13 = scmp.ne.s32.totalorder %s157_s30, %s1275_s5  ;;  %p1283_p3 = scmp.lt.s32.totalorder %s157_s30, %s157_s30 }
   0xf   : > { %p1194_p11 = pneg %p1448_p10  ;;  %p1284_p4 = scmp.lt.s32.totalorder %s1275_s5, %s1275_s5 }
  0x11   : > { %p1195_p12 = pnand %p1202_p9, %p1194_p11  ;;  %p1285_p7 = por %p1284_p4, %p1283_p3 }
  0x13   : > { %p1277_p0 = pneg %p1195_p12 }
  0x15   : > { %p1278_p1 = pnand %p1277_p0, %p1276_p13 }
  0x17   : > { %p1279_p2 = pneg %p1278_p1 }
  0x19   : > { %p1286_p8 = pnand %p1285_p7, %p1279_p2 }
  0x1b   : > { %1289 = shalt.err (!%p1286_p8)
}
  0x1c   : > { %s1356_s6 = smov [#allocation2]   ;;  %187 = sbr.rel (%p1448_p10) target bundleno = 1108 (0x454), region = 36 }
  0x1d   : > { %1197 = dma.vmem_to_smem (!%p1195_p12), %s157_s30, 16, %s1356_s6, [#allocation4]  }
  0x21   : > { %1333 = dma.done.wait (%p1202_p9), [#allocation4], 16  }
  0x22   : > { %1335 = vsyncadd (%p1202_p9), [#allocation4], 4294967280 }
  0x23   : > { %193 = sfence }
  0x24   : > { %p218_p11 = scmp.lt.s32.totalorder %s1420_s19, 1  ;;  %s1357_s12 = smov 3   ;;  %v1359_v1 = vmov 4   ;;  %v1360_v2 = vmov 3   ;;  %v1361_v3 = vmov 0   ;;  %v1364_v8 = vmov 6  }
  0x25   : > { %s1358_s13 = smov 6   ;;  %1255 = vset.pattern.permute.xlu0 %v1359_v1  ;;  %1254 = vset.pattern.permute.xlu1 %v1360_v2  ;;  %s1362_s14 = smov 2   ;;  %v1365_v9 = vmov 7   ;;  %v1366_v10 = vmov 0.0   ;;  %v1367_v11 = vmov 1   ;;  %v1369_v14 = vmov 2  }
  0x26   : > { %s1467_s7 = scalar_select %p218_p11, %s1420_s19, 1  ;;  %869 = vmatprep.mubr.bf16.mxu1 %v1361_v3  ;;  %565 = vmatprep.mubr.f32.mxu0 %v1366_v10  ;;  %v1370_v22 = vmov 8   ;;  %v1371_v26 = vmov 5   ;;  %v228_v27 = vlaneseq }
  0x27   : > { %s1363_s20 = smov 124   ;;  %s1368_s22 = smov 125  }
  0x28   : > { %s1144_s8 = sshll.u32 %s1467_s7, 3  ;;  %v229_v28 = vand.u32 127, %v228_v27  ;;  %s1187_s23 = smul.u32 24, %s1467_s7 }
  0x29   : > { %s221_s11 = scalar_lea.vmem %s1717_s0, %s1144_s8  ;;  %s1179_s10 = sld [smem:[#allocation2 + $0x1]] }
  0x2a   : > { %v261_v0 = vld [vmem:[%s221_s11] sm:$0xff]  ;;  %v230_v29 = vadd.s32 128, %v229_v28  ;;  %v231_v30 = vcvt.s32.f32 %v229_v28  ;;  %s1557_s29 = scalar_lea.vmem %s1719_s2, %s1187_s23  ;;  %s1643_s11 = sld [smem:[#allocation2]] }
  0x2b   : > { %263 = vrot.lane.b32.xlu0 %v261_v0, %s1357_s12  ;;  %s1645_s12 = sld [smem:[#allocation2 + $0x2]]  ;;  %s1373_s5 = smov [#allocation5]  }
  0x2c   : > { %v232_v31 = vcvt.s32.f32 %v230_v29  ;;  %v233_v32 = vmul.f32 0.0625, %v231_v30  ;;  %s1294_s6 = sshll.u32 %s1373_s5, 4  ;;  %s1295_s6 = int_to_ptr.vmem [resolvable:$false] %s1294_s6 }
  0x2d   : > { %s1296_s7 = scalar_lea.vmem %s1295_s6, 512 }
  0x2e   : > { %v234_v33 = vmul.f32 0.0625, %v232_v31  ;;  %v235_v34 = vfloor.f32 %v233_v32 }
  0x2f   : > { %267 = vrot.lane.b32.xlu0 %v261_v0, %s1358_s13  ;;  %s215_s13 = sand.u32 1, %s1346_s16  }
  0x30   : > { %v236_v35 = vfloor.f32 %v234_v33  ;;  %v237_v36 = vmul.f32 16.0, %v235_v34  ;;  %s1040_s30 = scalar_lea.sflag [#allocation3], %s215_s13 }
  0x32   : > { %v238_v37 = vmul.f32 16.0, %v236_v35  ;;  %v239_v38 = vsub.f32 %v231_v30, %v237_v36 }
  0x34   : > { %v240_v39 = vsub.f32 %v232_v31, %v238_v37  ;;  %vm241_vm1 = vcmp.ge.f32.partialorder %v239_v38, 16.0  ;;  %vm247_vm3 = vcmp.lt.f32.partialorder %v239_v38, 0.0 }
  0x35   : > { %v243_v40 = vsel %vm241_vm1, 1.0, %v1366_v10  ;;  %v249_v44 = vsel %vm247_vm3, 1.0, %v1366_v10 }
  0x36   : > { %vm242_vm2 = vcmp.ge.f32.partialorder %v240_v39, 16.0  ;;  %vm248_vm4 = vcmp.lt.f32.partialorder %v240_v39, 0.0  ;;  %v245_v42 = vadd.f32 %v243_v40, %v235_v34 }
  0x37   : > { %v244_v41 = vsel %vm242_vm2, 1.0, %v1366_v10  ;;  %v250_v45 = vsel %vm248_vm4, 1.0, %v1366_v10 }
  0x38   : > { %v246_v43 = vadd.f32 %v244_v41, %v236_v35  ;;  %v251_v47 = vsub.f32 %v245_v42, %v249_v44 }
  0x3a   : > { %v252_v48 = vsub.f32 %v246_v43, %v250_v45  ;;  %v253_v50 = vmul.f32 16.0, %v251_v47  ;;  %v259_v58 = vadd.f32 0.5, %v251_v47 }
  0x3c   : > { %v254_v51 = vmul.f32 16.0, %v252_v48  ;;  %v255_v52 = vsub.f32 %v231_v30, %v253_v50  ;;  %v260_v59 = vadd.f32 0.5, %v252_v48 }
  0x3e   : > { %v256_v53 = vsub.f32 %v232_v31, %v254_v51  ;;  %v257_v56 = vadd.f32 0.5, %v255_v52 }
  0x40   : > { %v258_v57 = vadd.f32 0.5, %v256_v53 }
  0x9d   : > { %v264_v4 = vpop.permute.xlu0 %263 }
  0x9e   : > { %v266_v5 = vsub.f32 %v261_v0, %v264_v4 }
  0xa0   : > { %277 = vrot.lane.b32.xlu1 %v266_v5, %s1362_s14  ;;  %s1143_s14 = sshll.u32 %s215_s13, 4 }
  0xa1   : > { %v268_v6 = vpop.permute.xlu0 %267 }
  0xa2   : > { %v270_v7 = vsub.f32 %v261_v0, %v268_v6 }
  0xa4   : > { %272 = vrot.lane.b32.xlu1 %v270_v7, %s1363_s20  ;;  %s1186_s20 = sshll.u32 %s1420_s19, 8 }
  0xa8   : > { %305 = vperm.xlu1 %1254, %v261_v0  }
  0xac   : > { %1256 = vset.pattern.permute.xlu1 %v1364_v8 }
  0xad   : > { %317 = vperm.xlu1 %1256, %v261_v0  }
  0xb1   : > { %1257 = vset.pattern.permute.xlu1 %v1365_v9 }
  0xb2   : > { %323 = vperm.xlu1 %1257, %v261_v0  }
  0xb6   : > { %1259 = vset.pattern.permute.xlu1 %v1367_v11 }
  0xb7   : > { %299 = vperm.xlu1 %1259, %v261_v0  }
  0xbb   : > { %1261 = vset.pattern.permute.xlu1 %v1360_v2 }
 0x112   : > { %v278_v12 = vpop.permute.xlu1 %277 }
 0x113   : > { %v280_v13 = vmul.f32 %v278_v12, %v270_v7 }
 0x115   : > { %282 = vrot.lane.b32.xlu0 %v280_v13, %s1368_s22  ;;  %s217_s22 = scalar_lea.vmem [#allocation5], %s1143_s14 }
 0x116   : > { %v273_v15 = vpop.permute.xlu1 %272  ;;  %s1054_s23 = sshll.u32 %s217_s22, 4  ;;  %s1055_s23 = int_to_ptr.vmem [resolvable:$true] %s1054_s23 }
 0x117   : > { %v275_v16 = vmul.f32 %v273_v15, %v266_v5  ;;  %s1290_s19 = scalar_lea.vmem %s1055_s23, 256  ;;  %p1297_p13 = scmp.lt.s32.totalorder %s1055_s23, %s1295_s6 }
 0x118   : > { %p1291_p9 = scmp.ne.s32.totalorder %s1055_s23, %s1290_s19  ;;  %p1298_p0 = scmp.lt.s32.totalorder %s1296_s7, %s1290_s19 }
 0x119   : > { %311 = vperm.xlu0 %1255, %v261_v0  }
 0x11a   : > { %p1292_p10 = pnand %p1291_p9, %p1437_p5  ;;  %p1299_p1 = por %p1298_p0, %p1297_p13 }
 0x11c   : > { %p1293_p12 = pneg %p1292_p10 }
 0x11d   : > { %1258 = vset.pattern.permute.xlu0 %v1361_v3 }
 0x11e   : > { %293 = vperm.xlu0 %1258, %v261_v0   ;;  %p1300_p2 = pnand %p1299_p1, %p1293_p12 }
 0x122   : > { %1260 = vset.pattern.permute.xlu0 %v1369_v14 }
 0x123   : > { %371 = vperm.xlu0 %1260, %v261_v0   ;;  %v306_v46 = vpop.permute.xlu1 %305 }
 0x124   : > { %v308_v61 = vsub.f32 %v306_v46, %v257_v56  ;;  %v309_v62 = vsub.f32 %v306_v46, %v258_v57 }
 0x127   : > { %1264 = vset.pattern.permute.xlu0 %v1360_v2 }
 0x128   : > { %v318_v49 = vpop.permute.xlu1 %317 }
 0x129   : > { %v320_v63 = vsub.f32 %v318_v49, %v257_v56 }
 0x12d   : > { %v324_v54 = vpop.permute.xlu1 %323 }
 0x12e   : > { %v326_v5 = vsub.f32 %v324_v54, %v259_v58  ;;  %v327_v6 = vsub.f32 %v324_v54, %v260_v59 }
 0x130   : > { %v328_v14 = vmul.f32 %v326_v5, %v308_v61  ;;  %v329_v15 = vmul.f32 %v327_v6, %v309_v62 }
 0x132   : > { %v300_v60 = vpop.permute.xlu1 %299 }
 0x133   : > { %v302_v8 = vsub.f32 %v300_v60, %v259_v58  ;;  %v303_v11 = vsub.f32 %v300_v60, %v260_v59 }
 0x187   : > { %v283_v17 = vpop.permute.xlu0 %282 }
 0x188   : > { %v285_v18 = vsub.f32 %v275_v16, %v283_v17  ;;  %v341_v17 = vmul.f32 %v320_v63, %v302_v8 }
 0x18a   : > { %v286_v19 = vand.u32 2147483647, %v285_v18 }
 0x18c   : > { %vm287_vm0 = vcmp.gt.f32.partialorder %v286_v19, 1e-09 }
 0x18d   : > { %v289_v20 = vsel %vm287_vm0, %v285_v18, 1.0  ;;  %v363_v21 = vsel %vm287_vm0, 1, %v1361_v3  ;;  %v288_v24 = vsel %vm287_vm0, 1.0, %v1366_v10 }
 0x18e   : > { %1269 = vrcp.f32 %v289_v20  ;;  %365 = vperm.xlu0 %1264, %v363_v21  }
 0x192   : > { %1265 = vset.pattern.permute.xlu0 %v1370_v22 }
 0x194   : > { %v312_v55 = vpop.permute.xlu0 %311 }
 0x195   : > { %v314_v1 = vsub.f32 %v312_v55, %v259_v58  ;;  %v315_v2 = vsub.f32 %v312_v55, %v260_v59  ;;  %v1528_v58 = vshrl.u32 %v228_v27, 7 }
 0x197   : > { %v330_v12 = vmul.f32 %v320_v63, %v314_v1  ;;  %v1531_v63 = vcvt.s32.f32 %v1528_v58 }
 0x199   : > { %v294_v4 = vpop.permute.xlu0 %293  ;;  %v332_v20 = vsub.f32 %v328_v14, %v330_v12 }
 0x19a   : > { %v296_v7 = vsub.f32 %v294_v4, %v257_v56  ;;  %v297_v9 = vsub.f32 %v294_v4, %v258_v57 }
 0x19b   : > { %v1270_v23 = vpop.eup %1269 }
 0x19c   : > { %v291_v25 = vmul.f32 %v1270_v23, %v288_v24  ;;  %v343_v16 = vmul.f32 %v326_v5, %v296_v7  ;;  %v344_v18 = vmul.f32 %v327_v6, %v297_v9 }
 0x19e   : > { %336 = vperm.xlu1 %1261, %v291_v25   ;;  %v372_v32 = vpop.permute.xlu0 %371 }
 0x1a2   : > { %1262 = vset.pattern.permute.xlu1 %v1371_v26 }
 0x1a3   : > { %377 = vperm.xlu1 %1262, %v261_v0  }
 0x1a7   : > { %1263 = vset.pattern.permute.xlu1 %v1370_v22  ;;  %v345_v22 = vsub.f32 %v341_v17, %v343_v16 }
 0x1a8   : > { %385 = vperm.xlu1 %1263, %v261_v0   ;;  %v321_v0 = vsub.f32 %v318_v49, %v258_v57 }
 0x1aa   : > { %v331_v13 = vmul.f32 %v321_v0, %v315_v2  ;;  %v342_v19 = vmul.f32 %v321_v0, %v303_v11 }
 0x1ac   : > { %v333_v21 = vsub.f32 %v329_v15, %v331_v13  ;;  %v346_v24 = vsub.f32 %v342_v19, %v344_v18 }
 0x209   : > { %v366_v40 = vpop.permute.xlu0 %365 }
 0x20a   : > { %vm367_vm15 = vcmp.eq.s32.totalorder %v366_v40, 1 }
 0x219   : > { %v337_v23 = vpop.permute.xlu1 %336 }
 0x21a   : > { %v1483_v25 = vmul.f32 %v337_v23, %v332_v20  ;;  %v1485_v26 = vmul.f32 %v337_v23, %v333_v21  ;;  %v1487_v28 = vmul.f32 %v345_v22, %v337_v23  ;;  %v1489_v29 = vmul.f32 %v346_v24, %v337_v23 }
 0x21c   : > { %v349_v30 = vsub.f32 1.0, %v1483_v25  ;;  %v350_v31 = vsub.f32 1.0, %v1485_v26  ;;  %vm353_vm5 = vcmp.ge.f32.partialorder %v1483_v25, 0.0  ;;  %vm355_vm6 = vcmp.ge.f32.partialorder %v1487_v28, 0.0 }
 0x21d   : > { %vm354_vm7 = vcmp.ge.f32.partialorder %v1485_v26, 0.0  ;;  %vm356_vm8 = vcmp.ge.f32.partialorder %v1489_v29, 0.0  ;;  %v374_v38 = vmul.f32 %v372_v32, %v1483_v25  ;;  %v375_v39 = vmul.f32 %v372_v32, %v1485_v26  ;;  %vm357_vm10 = vmand %vm353_vm5, %vm355_vm6 }
 0x21e   : > { %v378_v33 = vpop.permute.xlu1 %377  ;;  %v351_v34 = vsub.f32 %v349_v30, %v1487_v28  ;;  %v352_v35 = vsub.f32 %v350_v31, %v1489_v29  ;;  %vm358_vm12 = vmand %vm354_vm7, %vm356_vm8 }
 0x21f   : > { %v380_v36 = vmul.f32 %v378_v33, %v1487_v28  ;;  %v381_v37 = vmul.f32 %v378_v33, %v1489_v29 }
 0x220   : > { %vm359_vm9 = vcmp.ge.f32.partialorder %v351_v34, 0.0  ;;  %vm360_vm11 = vcmp.ge.f32.partialorder %v352_v35, 0.0 }
 0x221   : > { %v382_v42 = vadd.f32 %v380_v36, %v374_v38  ;;  %v383_v43 = vadd.f32 %v381_v37, %v375_v39  ;;  %vm361_vm13 = vmand %vm357_vm10, %vm359_vm9 }
 0x222   : > { %vm362_vm14 = vmand %vm358_vm12, %vm360_vm11 }
 0x223   : > { %v386_v41 = vpop.permute.xlu1 %385  ;;  %vm368_vm0 = vmand %vm361_vm13, %vm367_vm15 }
 0x224   : > { %v388_v44 = vmul.f32 %v386_v41, %v351_v34  ;;  %v389_v45 = vmul.f32 %v386_v41, %v352_v35  ;;  %vm369_vm1 = vmand %vm362_vm14, %vm367_vm15  ;;  %v489_v35 = vld [vmem:[%s1557_s29 + $0x8] sm:$0xff] }
 0x226   : > { %v390_v46 = vadd.f32 %v388_v44, %v382_v42  ;;  %v391_v47 = vadd.f32 %v389_v45, %v383_v43  ;;  %v490_v44 = vld [vmem:[%s1557_s29 + $0x10] sm:$0xff] }
 0x228   : > { %vm396_vm2 = vcmp.lt.f32.partialorder %v390_v46, 1e+30  ;;  %vm397_vm3 = vcmp.lt.f32.partialorder %v391_v47, 1e+30 }
 0x229   : > { %vm1503_vm4 = vmand %vm368_vm0, %vm396_vm2  ;;  %vm491_vm0 = vcmask 64512  }
 0x22a   : > { %vm1507_vm5 = vmand %vm369_vm1, %vm397_vm3  ;;  %v400_v50 = vsel %vm1503_vm4, %v390_v46, 1e+30  ;;  %v402_v51 = vsel %vm1503_vm4, %v1483_v25, 0.0  ;;  %v404_v52 = vsel %vm1503_vm4, %v1487_v28, 0.0  ;;  %v406_v5 = vsel %vm1503_vm4, %v1531_v63, -1.0  ;;  %v488_v25 = vld [vmem:[%s1557_s29] sm:$0xff]  ;;  %s1680_s29 = scalar_lea.hbm %s1721_s4, %s1186_s20 }
 0x22b   : > { %v401_v53 = vsel %vm1507_vm5, %v391_v47, 1e+30  ;;  %v403_v54 = vsel %vm1507_vm5, %v1485_v26, 0.0  ;;  %v405_v55 = vsel %vm1507_vm5, %v1489_v29, 0.0  ;;  %v408_v56 = vrot.slane %v400_v50, 4 }
 0x22c   : > { %v414_v57 = vrot.slane %v401_v53, 4  ;;  %v407_v27 = vsel %vm1507_vm5, %v1531_v63, -1.0  ;;  %vm420_vm6 = vcmp.ge.f32.partialorder %v406_v5, 0.0  ;;  %v1372_v26 = vmov 1.0  }
 0x22d   : > { %v409_v59 = vmin.f32 %v400_v50, %v408_v56  ;;  %vm421_vm9 = vcmp.ge.f32.partialorder %v407_v27, 0.0 }
 0x22e   : > { %v415_v60 = vmin.f32 %v401_v53, %v414_v57 }
 0x22f   : > { %v410_v61 = vrot.slane %v409_v59, 2 }
 0x230   : > { %v416_v62 = vrot.slane %v415_v60, 2 }
 0x231   : > { %v411_v0 = vmin.f32 %v409_v59, %v410_v61 }
 0x232   : > { %v417_v1 = vmin.f32 %v415_v60, %v416_v62 }
 0x233   : > { %v412_v2 = vrot.slane %v411_v0, 1 }
 0x234   : > { %v418_v4 = vrot.slane %v417_v1, 1 }
 0x235   : > { %v413_v6 = vmin.f32 %v411_v0, %v412_v2 }
 0x236   : > { %v419_v7 = vmin.f32 %v417_v1, %v418_v4 }
 0x237   : > { %vm422_vm7 = vcmp.eq.f32.partialorder %v400_v50, %v413_v6 }
 0x238   : > { %vm423_vm8 = vcmp.eq.f32.partialorder %v401_v53, %v419_v7  ;;  %vm1539_vm10 = vmand %vm420_vm6, %vm422_vm7 }
 0x239   : > { %vm1543_vm11 = vmand %vm421_vm9, %vm423_vm8  ;;  %v426_v11 = vsel %vm1539_vm10, %v406_v5, 1e+09 }
 0x23a   : > { %v427_v12 = vsel %vm1543_vm11, %v407_v27, 1e+09  ;;  %v428_v13 = vrot.slane %v426_v11, 4 }
 0x23b   : > { %v434_v14 = vrot.slane %v427_v12, 4 }
 0x23c   : > { %v429_v15 = vmin.f32 %v426_v11, %v428_v13 }
 0x23d   : > { %v435_v16 = vmin.f32 %v427_v12, %v434_v14 }
 0x23e   : > { %v430_v17 = vrot.slane %v429_v15, 2 }
 0x23f   : > { %v436_v18 = vrot.slane %v435_v16, 2 }
 0x240   : > { %v431_v19 = vmin.f32 %v429_v15, %v430_v17 }
 0x241   : > { %v437_v20 = vmin.f32 %v435_v16, %v436_v18 }
 0x242   : > { %v432_v21 = vrot.slane %v431_v19, 1 }
 0x243   : > { %v438_v22 = vrot.slane %v437_v20, 1 }
 0x244   : > { %v1552_v23 = vmin.f32 %v431_v19, %v432_v21 }
 0x245   : > { %v1559_v24 = vmin.f32 %v437_v20, %v438_v22 }
 0x246   : > { %vm482_vm12 = vcmp.eq.f32.partialorder %v1531_v63, %v1552_v23  ;;  %vm440_vm13 = vcmp.eq.f32.partialorder %v406_v5, %v1552_v23 }
 0x247   : > { %vm441_vm14 = vcmp.eq.f32.partialorder %v407_v27, %v1559_v24  ;;  %vm483_vm15 = vcmp.eq.f32.partialorder %v1531_v63, %v1559_v24  ;;  %vm442_vm1 = vmand %vm1539_vm10, %vm440_vm13  ;;  %vm827_vm13 = vcmask 130048  }
 0x248   : > { %1150 = vmatprep.subr.msk.mxu0 %vm483_vm15, %v1372_v26  ;;  %v444_v28 = vsel %vm442_vm1, %v402_v51, 0.0  ;;  %vm443_vm2 = vmand %vm1543_vm11, %vm441_vm14  ;;  %v458_v29 = vsel %vm442_vm1, %v404_v52, 0.0 }
 0x249   : > { %1151 = vmatpush1.msk.msra.mxu0 %vm482_vm12, %v1372_v26  ;;  %v446_v30 = vrot.slane %v444_v28, 4  ;;  %v445_v31 = vsel %vm443_vm2, %v403_v54, 0.0  ;;  %v460_v32 = vrot.slane %v458_v29, 4  ;;  %v459_v34 = vsel %vm443_vm2, %v405_v55, 0.0 }
 0x24a   : > { %1152 = vmatmul.mubr.msk.f32.vlgmr.msra.gmra.mxu0 %vm491_vm0, %v488_v25  ;;  %v452_v33 = vrot.slane %v445_v31, 4  ;;  %v466_v38 = vrot.slane %v459_v34, 4 }
 0x24b   : > { %571 = vmatprep.mubr.f32.mxu0 %v1366_v10  ;;  %v447_v36 = vadd.f32 %v446_v30, %v444_v28  ;;  %v461_v37 = vadd.f32 %v460_v32, %v458_v29  ;;  %v614_v28 = vsub.s32 5, %v1528_v58 }
 0x24c   : > { %v453_v39 = vadd.f32 %v452_v33, %v445_v31  ;;  %v467_v42 = vadd.f32 %v466_v38, %v459_v34 }
 0x24d   : > { %v448_v40 = vrot.slane %v447_v36, 2  ;;  %v462_v41 = vrot.slane %v461_v37, 2 }
 0x24e   : > { %1153 = vmatmul.mubr.msk.f32.gmra.mxu0 %vm491_vm0, %v489_v35  ;;  %v454_v43 = vrot.slane %v453_v39, 2  ;;  %v468_v47 = vrot.slane %v467_v42, 2 }
 0x24f   : > { %577 = vmatprep.mubr.f32.mxu0 %v1366_v10  ;;  %v449_v45 = vadd.f32 %v448_v40, %v447_v36  ;;  %v463_v46 = vadd.f32 %v462_v41, %v461_v37 }
 0x250   : > { %v455_v48 = vadd.f32 %v454_v43, %v453_v39  ;;  %v469_v51 = vadd.f32 %v468_v47, %v467_v42 }
 0x251   : > { %v450_v49 = vrot.slane %v449_v45, 1  ;;  %v464_v50 = vrot.slane %v463_v46, 1 }
 0x252   : > { %1154 = vmatmul.mubr.msk.f32.gmra.mxu0 %vm491_vm0, %v490_v44  ;;  %v456_v52 = vrot.slane %v455_v48, 1  ;;  %v470_v54 = vrot.slane %v469_v51, 1 }
 0x253   : > { %v451_v53 = vadd.f32 %v450_v49, %v449_v45  ;;  %v465_v56 = vadd.f32 %v464_v50, %v463_v46 }
 0x254   : > { %v457_v55 = vadd.f32 %v456_v52, %v455_v48  ;;  %v471_v59 = vadd.f32 %v470_v54, %v469_v51 }
 0x255   : > { %v472_v57 = vsub.f32 1.0, %v451_v53 }
 0x256   : > { %v473_v60 = vsub.f32 1.0, %v457_v55 }
 0x257   : > { %v474_v61 = vsub.f32 %v472_v57, %v465_v56 }
 0x258   : > { %v475_v62 = vsub.f32 %v473_v60, %v471_v59 }
 0x30a   : > { %v567_v0 = vpop.f32.mrf.mxu0 }
 0x30b   : > { %v584_v4 = vmul.f32 %v567_v0, %v451_v53 }
 0x30c   : > { %v569_v1 = vpop.f32.mrf.mxu0 }
 0x30d   : > { %v585_v6 = vmul.f32 %v569_v1, %v457_v55 }
 0x30e   : > { %v573_v2 = vpop.f32.mrf.mxu0 }
 0x30f   : > { %v586_v5 = vmul.f32 %v573_v2, %v465_v56 }
 0x310   : > { %v575_v27 = vpop.f32.mrf.mxu0 }
 0x311   : > { %v590_v7 = vadd.f32 %v586_v5, %v584_v4  ;;  %v587_v8 = vmul.f32 %v575_v27, %v471_v59  ;;  %v664_v59 = vadd.s32 8, %v1528_v58 }
 0x312   : > { %v579_v9 = vpop.f32.mrf.mxu0 }
 0x313   : > { %v591_v11 = vadd.f32 %v587_v8, %v585_v6  ;;  %v588_v12 = vmul.f32 %v579_v9, %v474_v61 }
 0x314   : > { %v581_v13 = vpop.f32.mrf.mxu0 }
 0x315   : > { %v592_v14 = vadd.f32 %v590_v7, %v588_v12  ;;  %v589_v15 = vmul.f32 %v581_v13, %v475_v62 }
 0x317   : > { %vm594_vm3 = vcmp.ne.f32.partialorder %v592_v14, 0.0  ;;  %v593_v16 = vadd.f32 %v591_v11, %v589_v15 }
 0x318   : > { %v596_v17 = vsel %vm594_vm3, %v592_v14, 1.0 }
 0x319   : > { %1271 = vrcp.f32 %v596_v17  ;;  %vm595_vm4 = vcmp.ne.f32.partialorder %v593_v16, 0.0 }
 0x31a   : > { %v597_v18 = vsel %vm595_vm4, %v593_v16, 1.0 }
 0x31b   : > { %1273 = vrcp.f32 %v597_v18 }
 0x326   : > { %v1272_v19 = vpop.eup %1271 }
 0x327   : > { %v600_v20 = vmul.f32 %v1272_v19, %v596_v17 }
 0x328   : > { %v1274_v21 = vpop.eup %1273 }
 0x329   : > { %v602_v22 = vsub.f32 2.0, %v600_v20  ;;  %v601_v25 = vmul.f32 %v1274_v21, %v597_v18 }
 0x32b   : > { %v604_v26 = vmul.f32 %v1272_v19, %v602_v22  ;;  %v603_v29 = vsub.f32 2.0, %v601_v25 }
 0x32d   : > { %v606_v30 = vmul.f32 %v604_v26, %v584_v4  ;;  %v608_v31 = vmul.f32 %v604_v26, %v586_v5  ;;  %v610_v32 = vmul.f32 %v604_v26, %v588_v12  ;;  %v605_v33 = vmul.f32 %v1274_v21, %v603_v29 }
 0x32f   : > { %v615_v34 = vrot.slane %v606_v30, %v614_v28  ;;  %v625_v35 = vrot.slane %v608_v31, %v614_v28  ;;  %v637_v36 = vrot.slane %v610_v32, %v614_v28  ;;  %v607_v37 = vmul.f32 %v605_v33, %v585_v6 }
 0x330   : > { %v609_v38 = vmul.f32 %v605_v33, %v587_v8  ;;  %v611_v39 = vmul.f32 %v605_v33, %v589_v15  ;;  %v1588_v6 = vcvt.s32.f32 %v664_v59 }
 0x331   : > { %v620_v40 = vmul.f32 %v615_v34, %v567_v0  ;;  %v630_v41 = vmul.f32 %v625_v35, %v573_v2  ;;  %v619_v42 = vrot.slane %v607_v37, %v614_v28  ;;  %v642_v46 = vmul.f32 %v637_v36, %v579_v9 }
 0x332   : > { %v629_v43 = vrot.slane %v609_v38, %v614_v28  ;;  %v641_v44 = vrot.slane %v611_v39, %v614_v28  ;;  %v668_v0 = vsub.s32 4, %v1528_v58  ;;  %v738_v9 = vsub.s32 3, %v1528_v58 }
 0x333   : > { %v632_v45 = vadd.f32 %v630_v41, %v620_v40  ;;  %v621_v47 = vmul.f32 %v619_v42, %v569_v1 }
 0x334   : > { %v631_v48 = vmul.f32 %v629_v43, %v575_v27  ;;  %v643_v51 = vmul.f32 %v641_v44, %v581_v13 }
 0x335   : > { %v1580_v49 = vadd.f32 %v642_v46, %v632_v45 }
 0x336   : > { %v633_v50 = vadd.f32 %v631_v48, %v621_v47 }
 0x337   : > { %v646_v53 = vmul.f32 16.0, %v1580_v49 }
 0x338   : > { %v1582_v52 = vadd.f32 %v643_v51, %v633_v50 }
 0x339   : > { %v1155_v55 = vadd.f32 -0.5, %v646_v53 }
 0x33a   : > { %v647_v54 = vmul.f32 16.0, %v1582_v52 }
 0x33b   : > { %v650_v57 = vfloor.f32 %v1155_v55 }
 0x33c   : > { %v1156_v56 = vadd.f32 -0.5, %v647_v54 }
 0x33d   : > { %v652_v61 = vsub.f32 %v1155_v55, %v650_v57  ;;  %v654_v62 = vmax.f32 %v650_v57, 0.0  ;;  %v658_v1 = vadd.f32 1.0, %v650_v57 }
 0x33e   : > { %v651_v60 = vfloor.f32 %v1156_v56 }
 0x33f   : > { %v656_v27 = vmin.f32 %v654_v62, 15.0  ;;  %v660_v7 = vmax.f32 %v658_v1, 0.0  ;;  %v686_v8 = vsub.f32 1.0, %v652_v61  ;;  %v723_v17 = vrot.slane %v652_v61, %v668_v0 }
 0x340   : > { %v653_v2 = vsub.f32 %v1156_v56, %v651_v60  ;;  %v655_v4 = vmax.f32 %v651_v60, 0.0  ;;  %v659_v5 = vadd.f32 1.0, %v651_v60  ;;  %v791_v53 = vrot.slane %v652_v61, %v738_v9  ;;  %v1266_v61 = vld [vmem:[%s1720_s3] sm:$0xff]  }
 0x341   : > { %v662_v15 = vmin.f32 %v660_v7, 15.0  ;;  %v669_v16 = vrot.slane %v656_v27, %v668_v0  ;;  %v691_v21 = vrot.slane %v686_v8, %v668_v0  ;;  %v739_v25 = vrot.slane %v656_v27, %v738_v9 }
 0x342   : > { %v657_v11 = vmin.f32 %v655_v4, 15.0  ;;  %v661_v12 = vmax.f32 %v659_v5, 0.0  ;;  %v687_v13 = vsub.f32 1.0, %v653_v2  ;;  %v727_v14 = vrot.slane %v653_v2, %v668_v0 }
 0x343   : > { %vm674_vm5 = vcmp.eq.f32.partialorder %v1531_v63, %v669_v16  ;;  %vm676_vm6 = vcmp.eq.f32.partialorder %v1588_v6, %v669_v16  ;;  %v703_v22 = vrot.slane %v662_v15, %v668_v0  ;;  %vm744_vm14 = vcmp.eq.f32.partialorder %v1531_v63, %v739_v25 }
 0x344   : > { %v663_v18 = vmin.f32 %v661_v12, 15.0  ;;  %v673_v19 = vrot.slane %v657_v11, %v668_v0  ;;  %v695_v20 = vrot.slane %v687_v13, %v668_v0  ;;  %v1157_v28 = vsel %vm674_vm5, 1.0, %v1366_v10 }
 0x345   : > { %v1159_v31 = vsel %vm676_vm6, 1.0, %v1366_v10  ;;  %v696_v32 = vmul.f32 %v1157_v28, %v691_v21  ;;  %vm708_vm11 = vcmp.eq.f32.partialorder %v1531_v63, %v703_v22  ;;  %vm710_vm12 = vcmp.eq.f32.partialorder %v1588_v6, %v703_v22 }
 0x346   : > { %vm675_vm7 = vcmp.eq.f32.partialorder %v1531_v63, %v673_v19  ;;  %vm677_vm8 = vcmp.eq.f32.partialorder %v1588_v6, %v673_v19  ;;  %v707_v26 = vrot.slane %v663_v18, %v668_v0  ;;  %v698_v37 = vmul.f32 %v1159_v31, %v691_v21  ;;  %v1267_v19 = vld [vmem:[%s1720_s3 + $0x8] sm:$0xff]  }
 0x347   : > { %v1158_v29 = vsel %vm675_vm7, 1.0, %v1366_v10  ;;  %v1160_v30 = vsel %vm677_vm8, 1.0, %v1366_v10  ;;  %v1161_v40 = vsel %vm708_vm11, 1.0, %v1366_v10  ;;  %v1163_v41 = vsel %vm710_vm12, 1.0, %v1366_v10 }
 0x348   : > { %v697_v33 = vmul.f32 %v1158_v29, %v695_v20  ;;  %v699_v34 = vmul.f32 %v1160_v30, %v695_v20  ;;  %vm709_vm9 = vcmp.eq.f32.partialorder %v1531_v63, %v707_v26  ;;  %vm711_vm10 = vcmp.eq.f32.partialorder %v1588_v6, %v707_v26 }
 0x349   : > { %v1162_v35 = vsel %vm709_vm9, 1.0, %v1366_v10  ;;  %v1164_v36 = vsel %vm711_vm10, 1.0, %v1366_v10  ;;  %v728_v42 = vmul.f32 %v1161_v40, %v723_v17  ;;  %v759_v43 = vrot.slane %v686_v8, %v738_v9 }
 0x34a   : > { %v729_v38 = vmul.f32 %v1162_v35, %v727_v14  ;;  %v731_v39 = vmul.f32 %v1164_v36, %v727_v14  ;;  %v730_v46 = vmul.f32 %v1163_v41, %v723_v17  ;;  %v1165_v47 = vsel %vm744_vm14, 1.0, %v1366_v10 }
 0x34b   : > { %v732_v48 = vadd.f32 %v728_v42, %v696_v32  ;;  %v764_v50 = vmul.f32 %v1165_v47, %v759_v43  ;;  %v771_v51 = vrot.slane %v662_v15, %v738_v9  ;;  %v743_v56 = vrot.slane %v657_v11, %v738_v9 }
 0x34c   : > { %v733_v44 = vadd.f32 %v729_v38, %v697_v33  ;;  %v735_v45 = vadd.f32 %v731_v39, %v699_v34  ;;  %v734_v55 = vadd.f32 %v730_v46, %v698_v37  ;;  %v763_v57 = vrot.slane %v687_v13, %v738_v9 }
 0x34d   : > { %vm776_vm15 = vcmp.eq.f32.partialorder %v1531_v63, %v771_v51  ;;  %v775_v59 = vrot.slane %v663_v18, %v738_v9  ;;  %v795_v60 = vrot.slane %v653_v2, %v738_v9  ;;  %vm746_vm0 = vcmp.eq.f32.partialorder %v1588_v6, %v739_v25 }
 0x34e   : > { %v811_v54 = vpack.c.bf16 %v735_v45, %v733_v44  ;;  %v810_v62 = vpack.c.bf16 %v734_v55, %v732_v48  ;;  %v1169_v0 = vsel %vm776_vm15, 1.0, %v1366_v10  ;;  %vm745_vm1 = vcmp.eq.f32.partialorder %v1531_v63, %v743_v56 }
 0x34f   : > { %v1167_v1 = vsel %vm746_vm0, 1.0, %v1366_v10  ;;  %v796_v4 = vmul.f32 %v1169_v0, %v791_v53  ;;  %v1166_v5 = vsel %vm745_vm1, 1.0, %v1366_v10  ;;  %vm777_vm2 = vcmp.eq.f32.partialorder %v1531_v63, %v775_v59 }
 0x350   : > { %851 = vmatprep.subr.bf16.mxu1 %v811_v54  ;;  %v766_v2 = vmul.f32 %v1167_v1, %v759_v43  ;;  %v765_v27 = vmul.f32 %v1166_v5, %v763_v57  ;;  %v1170_v7 = vsel %vm777_vm2, 1.0, %v1366_v10  ;;  %vm778_vm3 = vcmp.eq.f32.partialorder %v1588_v6, %v771_v51 }
 0x351   : > { %852 = vmatpush1.bf16.msra.mxu1 %v810_v62  ;;  %vm747_vm4 = vcmp.eq.f32.partialorder %v1588_v6, %v743_v56  ;;  %v1622_v8 = vadd.f32 %v796_v4, %v764_v50  ;;  %v797_v9 = vmul.f32 %v1170_v7, %v795_v60  ;;  %v1171_v11 = vsel %vm778_vm3, 1.0, %v1366_v10 }
 0x352   : > { %v1168_v12 = vsel %vm747_vm4, 1.0, %v1366_v10  ;;  %v798_v13 = vmul.f32 %v1171_v11, %v791_v53  ;;  %vm779_vm5 = vcmp.eq.f32.partialorder %v1588_v6, %v775_v59  ;;  %v1268_v6 = vld [vmem:[%s1720_s3 + $0x10] sm:$0xff]   ;;  %v967_v28 = vstv %s1179_s10 }
 0x353   : > { %v767_v14 = vmul.f32 %v1168_v12, %v763_v57  ;;  %v1628_v63 = vadd.f32 %v797_v9, %v765_v27  ;;  %v1172_v15 = vsel %vm779_vm5, 1.0, %v1366_v10  ;;  %v968_v35 = vmul.f32 %v967_v28, %v1580_v49 }
 0x354   : > { %1176 = vmatmul.mubr.msk.bf16.vlgmr.msra.gmra.mxu1 %vm827_vm13, %v1266_v61  ;;  %v802_v16 = vadd.f32 %v798_v13, %v766_v2  ;;  %v799_v17 = vmul.f32 %v1172_v15, %v795_v60  ;;  %v963_v39 = vstv %s1643_s11  ;;  %v969_v40 = vmul.f32 %v967_v28, %v1582_v52 }
 0x355   : > { %879 = vmatprep.mubr.bf16.mxu1 %v1361_v3  ;;  %v979_v42 = vstv %s1645_s12  ;;  %v972_v46 = vrot.slane %v968_v35, 1  ;;  %v964_v54 = vmul.f32 %v963_v39, %v1580_v49  ;;  %v965_v0 = vmul.f32 %v963_v39, %v1582_v52 }
 0x356   : > { %v1632_v18 = vadd.f32 %v799_v17, %v767_v14  ;;  %v973_v55 = vrot.slane %v969_v40, 1  ;;  %v980_v56 = vmul.f32 %v979_v42, %v1580_v49  ;;  %v981_v61 = vmul.f32 %v979_v42, %v1582_v52 }
 0x357   : > { %v976_v1 = vadd.f32 %v972_v46, %v964_v54  ;;  %vm954_vm6 = vcmask 1040384   ;;  %vm476_vm7 = vcmp.lt.f32.partialorder %v1552_v23, 1e+09  ;;  %vm957_vm8 = vcmask 1041408  }
 0x358   : > { %v977_v7 = vadd.f32 %v973_v55, %v965_v0  ;;  %v984_v9 = vrot.slane %v980_v56, 2  ;;  %v998_v56 = vsub.s32 0, %v1528_v58  ;;  %vm477_vm9 = vcmp.lt.f32.partialorder %v1559_v24, 1e+09 }
 0x359   : > { %vm1028_vm10 = vcmask 1042432   ;;  %vm1031_vm11 = vcmask 1045504   ;;  %vm1034_vm12 = vcmask 1046528  }
 0x35c   : > { %1177 = vmatmul.mubr.msk.bf16.gmra.mxu1 %vm827_vm13, %v1267_v19  ;;  %v985_v19 = vrot.slane %v981_v61, 2 }
 0x35d   : > { %889 = vmatprep.mubr.bf16.mxu1 %v1361_v3 }
 0x364   : > { %1178 = vmatmul.mubr.msk.bf16.gmra.mxu1 %vm827_vm13, %v1268_v6  ;;  %v988_v6 = vadd.f32 %v984_v9, %v976_v1 }
 0x366   : > { %v990_v35 = vmax.f32 %v988_v6, 0.0 }
 0x414   : > { %v871_v20 = vpop.f32.mrf.mxu1 }
 0x415   : > { %v900_v25 = vmul.f32 %v871_v20, %v1622_v8 }
 0x416   : > { %v873_v21 = vpop.f32.mrf.mxu1 }
 0x417   : > { %v901_v29 = vmul.f32 %v873_v21, %v1628_v63 }
 0x418   : > { %v875_v22 = vpop.f32.mrf.mxu1 }
 0x419   : > { %v902_v26 = vmul.f32 %v875_v22, %v802_v16 }
 0x41a   : > { %v877_v3 = vpop.f32.mrf.mxu1 }
 0x41b   : > { %v904_v30 = vadd.f32 %v902_v26, %v900_v25  ;;  %v903_v31 = vmul.f32 %v877_v3, %v1632_v18 }
 0x41c   : > { %v881_v32 = vpop.f32.mrf.mxu1 }
 0x41d   : > { %v905_v33 = vrot.slane %v904_v30, 4  ;;  %v911_v34 = vadd.f32 %v903_v31, %v901_v29  ;;  %v918_v44 = vmul.f32 %v881_v32, %v1622_v8  ;;  %v989_v29 = vadd.f32 %v985_v19, %v977_v7 }
 0x41e   : > { %v883_v36 = vpop.f32.mrf.mxu1 }
 0x41f   : > { %v906_v37 = vadd.f32 %v905_v33, %v904_v30  ;;  %v912_v38 = vrot.slane %v911_v34, 4  ;;  %v919_v50 = vmul.f32 %v883_v36, %v1628_v63  ;;  %v991_v39 = vmax.f32 %v989_v29, 0.0 }
 0x420   : > { %v885_v41 = vpop.f32.mrf.mxu1 }
 0x421   : > { %v913_v43 = vadd.f32 %v912_v38, %v911_v34  ;;  %v920_v45 = vmul.f32 %v885_v41, %v802_v16  ;;  %v907_v47 = vrot.slane %v906_v37, 2 }
 0x422   : > { %v887_v48 = vpop.f32.mrf.mxu1 }
 0x423   : > { %v922_v51 = vadd.f32 %v920_v45, %v918_v44  ;;  %v921_v53 = vmul.f32 %v887_v48, %v1632_v18  ;;  %v914_v57 = vrot.slane %v913_v43, 2  ;;  %v908_v4 = vadd.f32 %v907_v47, %v906_v37 }
 0x424   : > { %v891_v59 = vpop.f32.mrf.mxu1  ;;  %v1011_v44 = vadd.f32 1.0, %v1582_v52  ;;  %v992_v45 = vmul.f32 0.7, %v990_v35 }
 0x425   : > { %v923_v60 = vrot.slane %v922_v51, 4  ;;  %v929_v62 = vadd.f32 %v921_v53, %v919_v50  ;;  %v915_v11 = vadd.f32 %v914_v57, %v913_v43  ;;  %v936_v15 = vmul.f32 %v891_v59, %v1622_v8 }
 0x426   : > { %v893_v5 = vpop.f32.mrf.mxu1  ;;  %v909_v20 = vrot.slane %v908_v4, 1  ;;  %v993_v50 = vmul.f32 0.7, %v991_v39  ;;  %v994_v55 = vadd.f32 0.3, %v992_v45 }
 0x427   : > { %v924_v2 = vadd.f32 %v923_v60, %v922_v51  ;;  %v930_v27 = vrot.slane %v929_v62, 4  ;;  %v937_v21 = vmul.f32 %v893_v5, %v1628_v63  ;;  %v916_v30 = vrot.slane %v915_v11, 1 }
 0x428   : > { %v895_v12 = vpop.f32.mrf.mxu1  ;;  %v910_v8 = vadd.f32 %v909_v20, %v908_v4  ;;  %v1010_v63 = vadd.f32 1.0, %v1580_v49  ;;  %v1013_v49 = vmul.f32 0.5, %v1011_v44  ;;  %v995_v52 = vadd.f32 0.3, %v993_v50 }
 0x429   : > { %v925_v13 = vrot.slane %v924_v2, 2  ;;  %v931_v14 = vadd.f32 %v930_v27, %v929_v62  ;;  %v938_v17 = vmul.f32 %v895_v12, %v802_v16  ;;  %v917_v40 = vadd.f32 %v916_v30, %v915_v11 }
 0x42a   : > { %v897_v22 = vpop.f32.mrf.mxu1  ;;  %v1012_v51 = vmul.f32 0.5, %v1010_v63  ;;  %v1146_v62 = vsel %vm476_vm7, 1.0, %v1366_v10  ;;  %v999_v61 = vrot.slane %v994_v55, %v998_v56  ;;  %v1015_v4 = vmax.f32 %v1013_v49, 0.0 }
 0x42b   : > { %v926_v25 = vadd.f32 %v925_v13, %v924_v2  ;;  %v932_v26 = vrot.slane %v931_v14, 2  ;;  %v940_v3 = vadd.f32 %v938_v17, %v936_v15  ;;  %v939_v28 = vmul.f32 %v897_v22, %v1632_v18 }
 0x42c   : > { %v1014_v60 = vmax.f32 %v1012_v51, 0.0  ;;  %v1147_v5 = vsel %vm477_vm9, 1.0, %v1366_v10  ;;  %v1003_v27 = vrot.slane %v995_v52, %v998_v56  ;;  %v1018_v9 = vmax.f32 %v1146_v62, 0.0 }
 0x42d   : > { %v927_v31 = vrot.slane %v926_v25, 1  ;;  %v933_v32 = vadd.f32 %v932_v26, %v931_v14  ;;  %v941_v33 = vrot.slane %v940_v3, 4  ;;  %v947_v34 = vadd.f32 %v939_v28, %v937_v21 }
 0x42e   : > { %v1016_v7 = vmin.f32 %v1014_v60, 1.0  ;;  %v1017_v13 = vmin.f32 %v1015_v4, 1.0  ;;  %v1019_v14 = vmax.f32 %v1147_v5, 0.0  ;;  %v1020_v10 = vmin.f32 %v1018_v9, 1.0 }
 0x42f   : > { %v928_v16 = vadd.f32 %v927_v31, %v926_v25  ;;  %v934_v36 = vrot.slane %v933_v32, 1  ;;  %v942_v37 = vadd.f32 %v941_v33, %v940_v3  ;;  %v948_v38 = vrot.slane %v947_v34, 4 }
 0x430   : > { %v1024_v19 = vrot.slane %v1016_v7, 5  ;;  %v1025_v20 = vrot.slane %v1017_v13, 5  ;;  %v1021_v22 = vmin.f32 %v1019_v14, 1.0 }
 0x431   : > { %v955_v41 = vsel %vm954_vm6, %v910_v8, %v928_v16  ;;  %v935_v42 = vadd.f32 %v934_v36, %v933_v32  ;;  %v943_v18 = vrot.slane %v942_v37, 2  ;;  %v949_v43 = vadd.f32 %v948_v38, %v947_v34 }
 0x433   : > { %v956_v46 = vsel %vm954_vm6, %v917_v40, %v935_v42  ;;  %v944_v47 = vadd.f32 %v943_v18, %v942_v37  ;;  %v950_v48 = vrot.slane %v949_v43, 2 }
 0x435   : > { %v945_v53 = vrot.slane %v944_v47, 1  ;;  %v951_v54 = vadd.f32 %v950_v48, %v949_v43 }
 0x437   : > { %v946_v57 = vadd.f32 %v945_v53, %v944_v47  ;;  %v952_v59 = vrot.slane %v951_v54, 1 }
 0x439   : > { %v958_v0 = vsel %vm957_vm8, %v955_v41, %v946_v57  ;;  %v953_v1 = vadd.f32 %v952_v59, %v951_v54 }
 0x43a   : > { %v960_v23 = vmul.f32 %v1146_v62, %v958_v0 }
 0x43b   : > { %v959_v58 = vsel %vm957_vm8, %v956_v46, %v953_v1 }
 0x43c   : > { %v961_v2 = vmul.f32 %v1147_v5, %v959_v58  ;;  %v1004_v24 = vmul.f32 %v999_v61, %v960_v23 }
 0x43e   : > { %v1005_v11 = vmul.f32 %v1003_v27, %v961_v2  ;;  %v1006_v12 = vmax.f32 %v1004_v24, 0.0 }
 0x440   : > { %v1007_v15 = vmax.f32 %v1005_v11, 0.0  ;;  %v1008_v17 = vmin.f32 %v1006_v12, 1.0 }
 0x442   : > { %v1009_v6 = vmin.f32 %v1007_v15, 1.0  ;;  %v1029_v21 = vsel %vm1028_vm10, %v1008_v17, %v1024_v19 }
 0x443   : > { %v1032_v25 = vsel %vm1031_vm11, %v1029_v21, %v1020_v10 }
 0x444   : > { %v1030_v26 = vsel %vm1028_vm10, %v1009_v6, %v1025_v20  ;;  %v1035_v3 = vsel %vm1034_vm12, %v1032_v25, 0.0 }
 0x445   : > { %v1033_v28 = vsel %vm1031_vm11, %v1030_v26, %v1021_v22  ;;  %1037 = vst [vmem:[%s217_s22] sm:$0xff] %v1035_v3 }
 0x446   : > { %v1036_v29 = vsel %vm1034_vm12, %v1033_v28, 0.0 }
 0x447   : > { %1038 = vst [vmem:[%s217_s22 + $0x8] sm:$0xff] %v1036_v29 }
 0x448   : > { %1303 = shalt.err (!%p1300_p2)
}
 0x449   : > { %s1304_s8 = scalar_lea.hbm %s1680_s29, 256  ;;  %s1308_s11 = scalar_lea.hbm %s1721_s4, 512 }
 0x44a   : > { %p1305_p3 = scmp.ne.s32.totalorder %s1680_s29, %s1304_s8  ;;  %p1309_p8 = scmp.lt.s32.totalorder %s1680_s29, %s1721_s4 }
 0x44b   : > { %p1310_p11 = scmp.lt.s32.totalorder %s1308_s11, %s1304_s8 }
 0x44c   : > { %p1306_p4 = pnand %p1305_p3, %p1437_p5 }
 0x44d   : > { %p1311_p9 = por %p1310_p11, %p1309_p8 }
 0x44e   : > { %p1307_p7 = pneg %p1306_p4 }
 0x450   : > { %p1312_p10 = pnand %p1311_p9, %p1307_p7 }
 0x452   : > { %1315 = shalt.err (!%p1312_p10)
}
 0x453   : > { %1192 = dma.vmem_to_hbm [thread:$0]  (%p1437_p5), %s1055_s23, 256, %s1680_s29, %s1040_s30  }
 0x454 PF: > { %p1204_p12 = scmp.ge.s32.totalorder %s1354_s18, 2  ;;  %s1066_s14 = sand.u32 1, %s1342_s15  }
 0x455   : > { %s1067_s20 = scalar_lea.sflag [#allocation3], %s1066_s14 }
 0x456   : > { %p1199_p13 = pnand %p1204_p12, %p1441_p6 }
 0x458   : > { %p1200_p0 = pneg %p1199_p13 }
 0x45a   : > { %1337 = dma.done.wait (%p1200_p0), %s1067_s20, 256  }
 0x45b   : > { %1339 = vsyncadd (%p1200_p0), %s1067_s20, 4294967040  ;;  %p15_p1 = scmp.ge.s32.totalorder %s1424_s21, 4   ;;  %s1733_s15 = smov %s1346_s16 }
 0x45c   : > { %s1734_s16 = smov %s1350_s17  ;;  %s1735_s17 = smov %s1435_s24 }
 0x45d   : > { %s1736_s18 = smov %s1424_s21  ;;  %17 = sbr.rel (!%p15_p1) target bundleno = 4 (0x4), region = 79 }
 0x462   :  { %1072 = vsyncpa [#allocation3], 1 }
 0x463   :  { %1074 = vsyncpa [#allocation3 + $0x1], 1 }
 0x464   :  { %1075 = vsyncpa [#allocation4], 1 }
 0x465   :  { %1077 = vsyncpa [#allocation4 + $0x1], 1 }

</bundles_post_ra>
